<compile_context>
chip_gen: v7x
topology: tpu7x:2x2x1
jax: 0.10.0
libtpu: 0.0.40
codegen_flags: <defaults>
</compile_context>

<pallas_src>
import numpy as np
import jax
import jax.numpy as jnp
from jax.experimental import pallas as pl
from jax.experimental.pallas import tpu as pltpu  # noqa: F401  (TPU backend)


# --------------------------- static index helpers --------------------------- #

def _reflect(i, n):
    if i < 0:
        return -i
    if i >= n:
        return 2 * n - 2 - i
    return i


def _blockdiag(m, n):
    """kron(I_n, m): apply the per-image row operator to a batch-stacked slab."""
    return np.kron(np.eye(n, dtype=np.float32), m.astype(np.float32))


def _conv_row_select(h, tap):
    """(h, h): output row r reads input row reflect(r + tap - 1)."""
    s = np.zeros((h, h), np.float32)
    for r in range(h):
        s[r, _reflect(r + tap - 1, h)] = 1.0
    return s


def _pool_row_select(h, phase):
    """(h//2, h): output row r reads input row 2r + phase."""
    s = np.zeros((h // 2, h), np.float32)
    for r in range(h // 2):
        s[r, 2 * r + phase] = 1.0
    return s


def _tconv_row_scatter(h, dy, i):
    """(2h, h): fine output row 2Y+dy reads coarse row Y-1+dy+i (zero padded)."""
    s = np.zeros((2 * h, h), np.float32)
    for y in range(h):
        r = y - 1 + dy + i
        if 0 <= r < h:
            s[2 * y + dy, r] = 1.0
    return s


def _conv_col_onehot(w):
    """(w_in, 3, w_out): horizontal tap j of output col o reads reflect(o+j-1)."""
    a = np.zeros((w, 3, w), np.float32)
    for o in range(w):
        for j in range(3):
            a[_reflect(o + j - 1, w), j, o] += 1.0
    return a


def _tconv_col_onehot(w):
    """(w_in, 4, 2*w_out): tap dx*2+j of fine col 2X+dx reads X-1+dx+j (zero pad)."""
    a = np.zeros((w, 4, 2 * w), np.float32)
    for x in range(w):
        for dx in range(2):
            for j in range(2):
                wi = x - 1 + dx + j
                if 0 <= wi < w:
                    a[wi, dx * 2 + j, 2 * x + dx] = 1.0
    return a


def _pool_col_onehot(w, phase):
    """(w, 1, w//2): output col o reads input col 2o + phase."""
    a = np.zeros((w, 1, w // 2), np.float32)
    for o in range(w // 2):
        a[2 * o + phase, 0, o] = 1.0
    return a


def _band(a_onehot, taps):
    """Banded right-operator: B[wi*Cin+ci, wo*Cout+co] = sum_j A[wi,j,wo]*T[j,ci,co]."""
    b4 = jnp.einsum("ijo,jcd->icod", jnp.asarray(a_onehot), taps)
    wi, ci, wo, co = b4.shape
    return b4.reshape(wi * ci, wo * co).astype(jnp.float32)


# ------------------- one-time parameter preparation (host) ------------------ #

def prepare_kernel_params(p, batch=2, height=16, width=16):
    """Pre-transform all PyTorch-layout weights into the static selection /
    banded matrices consumed by the fused kernel.  Called ONCE, outside the
    forward pass (review: hoist weight munging out of net_forward)."""
    n = batch
    f32 = jnp.float32

    def conv_ops(w, b, h, wd):                      # Conv2d k=3, reflect pad 1
        a = _conv_col_onehot(wd)
        s = np.stack([_blockdiag(_conv_row_select(h, i), n) for i in range(3)])
        bands = jnp.stack(
            [_band(a, jnp.transpose(w[:, :, i, :], (2, 1, 0))) for i in range(3)])
        brow = jnp.tile(b.astype(f32), (wd,))[None, :]
        return jnp.asarray(s), bands, brow

    def pool_ops(h, wd, c):                         # maxpool 2x2 stride 2
        pr = np.stack([_blockdiag(_pool_row_select(h, ph), n) for ph in range(2)])
        eye = jnp.eye(c, dtype=f32)[None]
        g = jnp.stack([_band(_pool_col_onehot(wd, ph), eye) for ph in range(2)])
        return jnp.asarray(pr), g

    def tconv_ops(wt, b, h, wd):                    # ConvTranspose2d k=4 s=2 p=1
        a = _tconv_col_onehot(wd)
        lmats, rmats = [], []
        for dy in range(2):
            for i in range(2):
                lmats.append(_blockdiag(_tconv_row_scatter(h, dy, i), n))
                ky = 3 - dy - 2 * i
                taps = jnp.stack([wt[:, :, ky, 3 - dx - 2 * j]
                                  for dx in range(2) for j in range(2)])
                rmats.append(_band(a, taps))
        brow = jnp.tile(b.astype(f32), (2 * wd,))[None, :]
        return jnp.asarray(np.stack(lmats)), jnp.stack(rmats), brow

    h1, w1 = height, width
    h2, w2 = h1 // 2, w1 // 2
    h3, w3 = h2 // 2, w2 // 2

    c1s, c1bnd, c1b = conv_ops(p["w1"], p["b1"], h1, w1)
    p1p, p1g = pool_ops(h1, w1, p["w1"].shape[0])
    c2s, c2bnd, c2b = conv_ops(p["w2"], p["b2"], h2, w2)
    p2p, p2g = pool_ops(h2, w2, p["w2"].shape[0])
    c3s, c3bnd, c3b = conv_ops(p["w3"], p["b3"], h3, w3)
    t1l, t1r, t1b = tconv_ops(p["tw1"], p["tb1"], h3, w3)
    t2l, t2r, t2b = tconv_ops(p["tw2"], p["tb2"], h2, w2)

    # final 1x1 conv, output channels zero-padded 2 -> 8 for a lane-dense store
    cf_in = p["wf"].shape[1]
    wf = p["wf"][:, :, 0, 0]                                       # (2, Cin)
    tf = jnp.zeros((1, cf_in, 8), f32).at[0, :, : wf.shape[0]].set(wf.T)
    af = np.zeros((w1, 1, w1), np.float32)
    for o in range(w1):
        af[o, 0, o] = 1.0
    fbnd = _band(af, tf)
    bf = jnp.zeros((8,), f32).at[: p["bf"].shape[0]].set(p["bf"])
    fb = jnp.tile(bf, (w1,))[None, :]

    return (c1s, c1bnd, c1b, p1p, p1g,
            c2s, c2bnd, c2b, p2p, p2g,
            c3s, c3bnd, c3b,
            t1l, t1r, t1b,
            t2l, t2r, t2b,
            fbnd, fb)


# ------------------------------ fused kernel -------------------------------- #

def _net_kernel(x_ref,
                c1s, c1bnd, c1b, p1p, p1g,
                c2s, c2bnd, c2b, p2p, p2g,
                c3s, c3bnd, c3b,
                t1l, t1r, t1b,
                t2l, t2r, t2b,
                fbnd, fb,
                o_ref):
    def dot(a, b):
        return jnp.dot(a, b, preferred_element_type=jnp.float32)

    def lrsum(a, l_ref, r_ref, b_ref):
        """conv / transpose-conv:  sum_i L_i @ a @ R_i + bias_row"""
        acc = dot(dot(l_ref[0], a), r_ref[0])
        for i in range(1, l_ref.shape[0]):
            acc = acc + dot(dot(l_ref[i], a), r_ref[i])
        return acc + b_ref[...]

    def pool_relu(y, p_ref, g_ref):
        t = jnp.maximum(dot(p_ref[0], y), dot(p_ref[1], y))   # vertical 2-max
        t = jnp.maximum(dot(t, g_ref[0]), dot(t, g_ref[1]))   # horizontal 2-max
        return jnp.maximum(t, 0.0)

    a = x_ref[...]                                            # (N*16, 16*2)
    a = pool_relu(lrsum(a, c1s, c1bnd, c1b), p1p, p1g)        # (N*8,  8*8)
    a = pool_relu(lrsum(a, c2s, c2bnd, c2b), p2p, p2g)        # (N*4,  4*16)
    a = jnp.maximum(lrsum(a, c3s, c3bnd, c3b), 0.0)           # (N*4,  4*32)
    a = jnp.maximum(lrsum(a, t1l, t1r, t1b), 0.0)             # (N*8,  8*16)
    a = jnp.maximum(lrsum(a, t2l, t2r, t2b), 0.0)             # (N*16, 16*8)
    o_ref[...] = dot(a, fbnd[...]) + fb[...]                  # (N*16, 16*8) lane-dense


def _full_spec(shape):
    nd = len(shape)
    return pl.BlockSpec(shape, lambda i, _nd=nd: (0,) * _nd)


@jax.jit
def net_forward(x_nchw, prep):
    n, cin, h, w = x_nchw.shape
    x2d = jnp.transpose(x_nchw, (0, 2, 3, 1)).reshape(n * h, w * cin)
    args = (x2d,) + tuple(prep)
    out2d = pl.pallas_call(
        _net_kernel,
        out_shape=jax.ShapeDtypeStruct((n * h, w * 8), jnp.float32),
        grid=(1,),
        in_specs=[_full_spec(a.shape) for a in args],
        out_specs=_full_spec((n * h, w * 8)),
    )(*args)
    out = out2d.reshape(n, h, w, 8)[..., :2]                  # drop the pad channels
    return jnp.transpose(out, (0, 3, 1, 2))                   # NHWC -> NCHW


# ------------------------------ test harness -------------------------------- #

def init_params(key):
    """He-uniform-ish init (larger than the PyTorch default so activations stay
    O(1) and the numerical cross-check below is sensitive)."""
    def conv_init(key, cout, cin, kh, kw):
        k1, k2 = jax.random.split(key)
        fan_in = cin * kh * kw
        wb, bb = (6.0 / fan_in) ** 0.5, 1.0 / fan_in ** 0.5
        w = jax.random.uniform(k1, (cout, cin, kh, kw), jnp.float32, -wb, wb)
        b = jax.random.uniform(k2, (cout,), jnp.float32, -bb, bb)
        return w, b

    def tconv_init(key, cin, cout, kh, kw):
        k1, k2 = jax.random.split(key)
        fan_in = cout * kh * kw
        wb, bb = (6.0 / fan_in) ** 0.5, 1.0 / fan_in ** 0.5
        w = jax.random.uniform(k1, (cin, cout, kh, kw), jnp.float32, -wb, wb)
        b = jax.random.uniform(k2, (cout,), jnp.float32, -bb, bb)
        return w, b

    keys = jax.random.split(key, 6)
    p = {}
    p["w1"], p["b1"] = conv_init(keys[0], 8, 2, 3, 3)
    p["w2"], p["b2"] = conv_init(keys[1], 16, 8, 3, 3)
    p["w3"], p["b3"] = conv_init(keys[2], 32, 16, 3, 3)
    p["tw1"], p["tb1"] = tconv_init(keys[3], 32, 16, 4, 4)
    p["tw2"], p["tb2"] = tconv_init(keys[4], 16, 8, 4, 4)
    p["wf"], p["bf"] = conv_init(keys[5], 2, 8, 1, 1)
    return p


def net_reference(x, p):
    """Plain-JAX reference of the PyTorch forward (for numerical validation)."""
    dn = ("NCHW", "OIHW", "NCHW")
    prec = jax.lax.Precision.HIGHEST

    def conv_reflect(x, w, b):
        xp = jnp.pad(x, ((0, 0), (0, 0), (1, 1), (1, 1)), mode="reflect")
        y = jax.lax.conv_general_dilated(xp, w, (1, 1), "VALID",
                                         dimension_numbers=dn, precision=prec)
        return y + b[None, :, None, None]

    def pool_relu(x):
        n, c, h, w = x.shape
        v = x.reshape(n, c, h // 2, 2, w // 2, 2).max(axis=(3, 5))
        return jnp.maximum(v, 0.0)

    def tconv(x, wt, b):
        w = jnp.flip(wt, (2, 3)).transpose(1, 0, 2, 3)        # (Cout, Cin, 4, 4)
        y = jax.lax.conv_general_dilated(x, w, (1, 1), [(2, 2), (2, 2)],
                                         lhs_dilation=(2, 2),
                                         dimension_numbers=dn, precision=prec)
        return y + b[None, :, None, None]

    x = pool_relu(conv_reflect(x, p["w1"], p["b1"]))
    x = pool_relu(conv_reflect(x, p["w2"], p["b2"]))
    x = jnp.maximum(conv_reflect(x, p["w3"], p["b3"]), 0.0)
    x = jnp.maximum(tconv(x, p["tw1"], p["tb1"]), 0.0)
    x = jnp.maximum(tconv(x, p["tw2"], p["tb2"]), 0.0)
    y = jax.lax.conv_general_dilated(x, p["wf"], (1, 1), "VALID",
                                     dimension_numbers=dn, precision=prec)
    return y + p["bf"][None, :, None, None]


if __name__ == "__main__":
    key = jax.random.PRNGKey(0)
    k_x, k_p = jax.random.split(key)
    x = jax.random.normal(k_x, (2, 2, 16, 16), dtype=jnp.float32)   # NCHW
    params = init_params(k_p)

    prep = prepare_kernel_params(params, batch=2, height=16, width=16)   # one-time

    out = net_forward(x, prep)
    jax.block_until_ready(out)

    assert out.shape == (2, 2, 16, 16), out.shape
    assert out.dtype == jnp.float32

    ref = net_reference(x, params)
    err = float(jnp.max(jnp.abs(out - ref)))
    assert err < 1e-2, f"max abs error vs reference: {err}"

    print("KERNEL_OK")
</pallas_src>

<mosaic_0001>
module attributes {stable_mosaic.version = 11 : i64} {
  func.func @_net_kernel(%arg0: i32, %arg1: memref<32x32xf32, #tpu.memory_space<vmem>>, %arg2: memref<3x32x32xf32, #tpu.memory_space<vmem>>, %arg3: memref<3x32x128xf32, #tpu.memory_space<vmem>>, %arg4: memref<1x128xf32, #tpu.memory_space<vmem>>, %arg5: memref<2x16x32xf32, #tpu.memory_space<vmem>>, %arg6: memref<2x128x64xf32, #tpu.memory_space<vmem>>, %arg7: memref<3x16x16xf32, #tpu.memory_space<vmem>>, %arg8: memref<3x64x128xf32, #tpu.memory_space<vmem>>, %arg9: memref<1x128xf32, #tpu.memory_space<vmem>>, %arg10: memref<2x8x16xf32, #tpu.memory_space<vmem>>, %arg11: memref<2x128x64xf32, #tpu.memory_space<vmem>>, %arg12: memref<3x8x8xf32, #tpu.memory_space<vmem>>, %arg13: memref<3x64x128xf32, #tpu.memory_space<vmem>>, %arg14: memref<1x128xf32, #tpu.memory_space<vmem>>, %arg15: memref<4x16x8xf32, #tpu.memory_space<vmem>>, %arg16: memref<4x128x128xf32, #tpu.memory_space<vmem>>, %arg17: memref<1x128xf32, #tpu.memory_space<vmem>>, %arg18: memref<4x32x16xf32, #tpu.memory_space<vmem>>, %arg19: memref<4x128x128xf32, #tpu.memory_space<vmem>>, %arg20: memref<1x128xf32, #tpu.memory_space<vmem>>, %arg21: memref<128x128xf32, #tpu.memory_space<vmem>>, %arg22: memref<1x128xf32, #tpu.memory_space<vmem>>, %arg23: memref<32x128xf32, #tpu.memory_space<vmem>>) attributes {dimension_semantics = [#tpu.dimension_semantics<arbitrary>], iteration_bounds = array<i64: 1>, scalar_prefetch = 0 : i64, scratch_operands = 0 : i64, tpu.core_type = #tpu.core_type<tc>, window_params = [{pipeline_mode = #tpu.pipeline_mode<synchronous>, transform_indices = @transform_0, window_bounds = array<i64: 32, 32>}, {pipeline_mode = #tpu.pipeline_mode<synchronous>, transform_indices = @transform_1, window_bounds = array<i64: 3, 32, 32>}, {pipeline_mode = #tpu.pipeline_mode<synchronous>, transform_indices = @transform_2, window_bounds = array<i64: 3, 32, 128>}, {pipeline_mode = #tpu.pipeline_mode<synchronous>, transform_indices = @transform_3, window_bounds = array<i64: 1, 128>}, {pipeline_mode = #tpu.pipeline_mode<synchronous>, transform_indices = @transform_4, window_bounds = array<i64: 2, 16, 32>}, {pipeline_mode = #tpu.pipeline_mode<synchronous>, transform_indices = @transform_5, window_bounds = array<i64: 2, 128, 64>}, {pipeline_mode = #tpu.pipeline_mode<synchronous>, transform_indices = @transform_6, window_bounds = array<i64: 3, 16, 16>}, {pipeline_mode = #tpu.pipeline_mode<synchronous>, transform_indices = @transform_7, window_bounds = array<i64: 3, 64, 128>}, {pipeline_mode = #tpu.pipeline_mode<synchronous>, transform_indices = @transform_8, window_bounds = array<i64: 1, 128>}, {pipeline_mode = #tpu.pipeline_mode<synchronous>, transform_indices = @transform_9, window_bounds = array<i64: 2, 8, 16>}, {pipeline_mode = #tpu.pipeline_mode<synchronous>, transform_indices = @transform_10, window_bounds = array<i64: 2, 128, 64>}, {pipeline_mode = #tpu.pipeline_mode<synchronous>, transform_indices = @transform_11, window_bounds = array<i64: 3, 8, 8>}, {pipeline_mode = #tpu.pipeline_mode<synchronous>, transform_indices = @transform_12, window_bounds = array<i64: 3, 64, 128>}, {pipeline_mode = #tpu.pipeline_mode<synchronous>, transform_indices = @transform_13, window_bounds = array<i64: 1, 128>}, {pipeline_mode = #tpu.pipeline_mode<synchronous>, transform_indices = @transform_14, window_bounds = array<i64: 4, 16, 8>}, {pipeline_mode = #tpu.pipeline_mode<synchronous>, transform_indices = @transform_15, window_bounds = array<i64: 4, 128, 128>}, {pipeline_mode = #tpu.pipeline_mode<synchronous>, transform_indices = @transform_16, window_bounds = array<i64: 1, 128>}, {pipeline_mode = #tpu.pipeline_mode<synchronous>, transform_indices = @transform_17, window_bounds = array<i64: 4, 32, 16>}, {pipeline_mode = #tpu.pipeline_mode<synchronous>, transform_indices = @transform_18, window_bounds = array<i64: 4, 128, 128>}, {pipeline_mode = #tpu.pipeline_mode<synchronous>, transform_indices = @transform_19, window_bounds = array<i64: 1, 128>}, {pipeline_mode = #tpu.pipeline_mode<synchronous>, transform_indices = @transform_20, window_bounds = array<i64: 128, 128>}, {pipeline_mode = #tpu.pipeline_mode<synchronous>, transform_indices = @transform_21, window_bounds = array<i64: 1, 128>}, {pipeline_mode = #tpu.pipeline_mode<synchronous>, transform_indices = @transform_22, window_bounds = array<i64: 32, 128>}]} {
    %c0 = arith.constant 0 : index
    %c0_0 = arith.constant 0 : index
    %0 = vector.load %arg1[%c0, %c0_0] : memref<32x32xf32, #tpu.memory_space<vmem>>, vector<32x32xf32>
    %c0_1 = arith.constant 0 : index
    %c0_2 = arith.constant 0 : index
    %c0_3 = arith.constant 0 : index
    %1 = vector.load %arg2[%c0_1, %c0_2, %c0_3] : memref<3x32x32xf32, #tpu.memory_space<vmem>>, vector<1x32x32xf32>
    %2 = vector.shape_cast %1 : vector<1x32x32xf32> to vector<32x32xf32>
    %cst = arith.constant dense<0.000000e+00> : vector<32x32xf32>
    %3 = tpu.matmul %2, %0, %cst {dimension_numbers = #tpu.dot_dimension_numbers<[1], [0], [0], [1], [0, 0, 1, 1], [], []>} : vector<32x32xf32>, vector<32x32xf32>, vector<32x32xf32> -> vector<32x32xf32>
    %c0_4 = arith.constant 0 : index
    %c0_5 = arith.constant 0 : index
    %c0_6 = arith.constant 0 : index
    %4 = vector.load %arg3[%c0_4, %c0_5, %c0_6] : memref<3x32x128xf32, #tpu.memory_space<vmem>>, vector<1x32x128xf32>
    %5 = vector.shape_cast %4 : vector<1x32x128xf32> to vector<32x128xf32>
    %cst_7 = arith.constant dense<0.000000e+00> : vector<32x128xf32>
    %6 = tpu.matmul %3, %5, %cst_7 {dimension_numbers = #tpu.dot_dimension_numbers<[1], [0], [0], [1], [0, 0, 1, 1], [], []>} : vector<32x32xf32>, vector<32x128xf32>, vector<32x128xf32> -> vector<32x128xf32>
    %c1 = arith.constant 1 : index
    %c0_8 = arith.constant 0 : index
    %c0_9 = arith.constant 0 : index
    %7 = vector.load %arg2[%c1, %c0_8, %c0_9] : memref<3x32x32xf32, #tpu.memory_space<vmem>>, vector<1x32x32xf32>
    %8 = vector.shape_cast %7 : vector<1x32x32xf32> to vector<32x32xf32>
    %cst_10 = arith.constant dense<0.000000e+00> : vector<32x32xf32>
    %9 = tpu.matmul %8, %0, %cst_10 {dimension_numbers = #tpu.dot_dimension_numbers<[1], [0], [0], [1], [0, 0, 1, 1], [], []>} : vector<32x32xf32>, vector<32x32xf32>, vector<32x32xf32> -> vector<32x32xf32>
    %c1_11 = arith.constant 1 : index
    %c0_12 = arith.constant 0 : index
    %c0_13 = arith.constant 0 : index
    %10 = vector.load %arg3[%c1_11, %c0_12, %c0_13] : memref<3x32x128xf32, #tpu.memory_space<vmem>>, vector<1x32x128xf32>
    %11 = vector.shape_cast %10 : vector<1x32x128xf32> to vector<32x128xf32>
    %cst_14 = arith.constant dense<0.000000e+00> : vector<32x128xf32>
    %12 = tpu.matmul %9, %11, %cst_14 {dimension_numbers = #tpu.dot_dimension_numbers<[1], [0], [0], [1], [0, 0, 1, 1], [], []>} : vector<32x32xf32>, vector<32x128xf32>, vector<32x128xf32> -> vector<32x128xf32>
    %13 = arith.addf %6, %12 : vector<32x128xf32>
    %c2 = arith.constant 2 : index
    %c0_15 = arith.constant 0 : index
    %c0_16 = arith.constant 0 : index
    %14 = vector.load %arg2[%c2, %c0_15, %c0_16] : memref<3x32x32xf32, #tpu.memory_space<vmem>>, vector<1x32x32xf32>
    %15 = vector.shape_cast %14 : vector<1x32x32xf32> to vector<32x32xf32>
    %cst_17 = arith.constant dense<0.000000e+00> : vector<32x32xf32>
    %16 = tpu.matmul %15, %0, %cst_17 {dimension_numbers = #tpu.dot_dimension_numbers<[1], [0], [0], [1], [0, 0, 1, 1], [], []>} : vector<32x32xf32>, vector<32x32xf32>, vector<32x32xf32> -> vector<32x32xf32>
    %c2_18 = arith.constant 2 : index
    %c0_19 = arith.constant 0 : index
    %c0_20 = arith.constant 0 : index
    %17 = vector.load %arg3[%c2_18, %c0_19, %c0_20] : memref<3x32x128xf32, #tpu.memory_space<vmem>>, vector<1x32x128xf32>
    %18 = vector.shape_cast %17 : vector<1x32x128xf32> to vector<32x128xf32>
    %cst_21 = arith.constant dense<0.000000e+00> : vector<32x128xf32>
    %19 = tpu.matmul %16, %18, %cst_21 {dimension_numbers = #tpu.dot_dimension_numbers<[1], [0], [0], [1], [0, 0, 1, 1], [], []>} : vector<32x32xf32>, vector<32x128xf32>, vector<32x128xf32> -> vector<32x128xf32>
    %20 = arith.addf %13, %19 : vector<32x128xf32>
    %c0_22 = arith.constant 0 : index
    %c0_23 = arith.constant 0 : index
    %21 = vector.load %arg4[%c0_22, %c0_23] : memref<1x128xf32, #tpu.memory_space<vmem>>, vector<1x128xf32>
    %22 = vector.broadcast %21 : vector<1x128xf32> to vector<32x128xf32>
    %23 = arith.addf %20, %22 : vector<32x128xf32>
    %c0_24 = arith.constant 0 : index
    %c0_25 = arith.constant 0 : index
    %c0_26 = arith.constant 0 : index
    %24 = vector.load %arg5[%c0_24, %c0_25, %c0_26] : memref<2x16x32xf32, #tpu.memory_space<vmem>>, vector<1x16x32xf32>
    %25 = vector.shape_cast %24 : vector<1x16x32xf32> to vector<16x32xf32>
    %cst_27 = arith.constant dense<0.000000e+00> : vector<16x128xf32>
    %26 = tpu.matmul %25, %23, %cst_27 {dimension_numbers = #tpu.dot_dimension_numbers<[1], [0], [0], [1], [0, 0, 1, 1], [], []>} : vector<16x32xf32>, vector<32x128xf32>, vector<16x128xf32> -> vector<16x128xf32>
    %c1_28 = arith.constant 1 : index
    %c0_29 = arith.constant 0 : index
    %c0_30 = arith.constant 0 : index
    %27 = vector.load %arg5[%c1_28, %c0_29, %c0_30] : memref<2x16x32xf32, #tpu.memory_space<vmem>>, vector<1x16x32xf32>
    %28 = vector.shape_cast %27 : vector<1x16x32xf32> to vector<16x32xf32>
    %cst_31 = arith.constant dense<0.000000e+00> : vector<16x128xf32>
    %29 = tpu.matmul %28, %23, %cst_31 {dimension_numbers = #tpu.dot_dimension_numbers<[1], [0], [0], [1], [0, 0, 1, 1], [], []>} : vector<16x32xf32>, vector<32x128xf32>, vector<16x128xf32> -> vector<16x128xf32>
    %30 = arith.maximumf %26, %29 : vector<16x128xf32>
    %c0_32 = arith.constant 0 : index
    %c0_33 = arith.constant 0 : index
    %c0_34 = arith.constant 0 : index
    %31 = vector.load %arg6[%c0_32, %c0_33, %c0_34] : memref<2x128x64xf32, #tpu.memory_space<vmem>>, vector<1x128x64xf32>
    %32 = vector.shape_cast %31 : vector<1x128x64xf32> to vector<128x64xf32>
    %cst_35 = arith.constant dense<0.000000e+00> : vector<16x64xf32>
    %33 = tpu.matmul %30, %32, %cst_35 {dimension_numbers = #tpu.dot_dimension_numbers<[1], [0], [0], [1], [0, 0, 1, 1], [], []>} : vector<16x128xf32>, vector<128x64xf32>, vector<16x64xf32> -> vector<16x64xf32>
    %c1_36 = arith.constant 1 : index
    %c0_37 = arith.constant 0 : index
    %c0_38 = arith.constant 0 : index
    %34 = vector.load %arg6[%c1_36, %c0_37, %c0_38] : memref<2x128x64xf32, #tpu.memory_space<vmem>>, vector<1x128x64xf32>
    %35 = vector.shape_cast %34 : vector<1x128x64xf32> to vector<128x64xf32>
    %cst_39 = arith.constant dense<0.000000e+00> : vector<16x64xf32>
    %36 = tpu.matmul %30, %35, %cst_39 {dimension_numbers = #tpu.dot_dimension_numbers<[1], [0], [0], [1], [0, 0, 1, 1], [], []>} : vector<16x128xf32>, vector<128x64xf32>, vector<16x64xf32> -> vector<16x64xf32>
    %37 = arith.maximumf %33, %36 : vector<16x64xf32>
    %cst_40 = arith.constant 0.000000e+00 : f32
    %38 = vector.broadcast %cst_40 : f32 to vector<16x64xf32>
    %39 = arith.maximumf %37, %38 : vector<16x64xf32>
    %c0_41 = arith.constant 0 : index
    %c0_42 = arith.constant 0 : index
    %c0_43 = arith.constant 0 : index
    %40 = vector.load %arg7[%c0_41, %c0_42, %c0_43] : memref<3x16x16xf32, #tpu.memory_space<vmem>>, vector<1x16x16xf32>
    %41 = vector.shape_cast %40 : vector<1x16x16xf32> to vector<16x16xf32>
    %cst_44 = arith.constant dense<0.000000e+00> : vector<16x64xf32>
    %42 = tpu.matmul %41, %39, %cst_44 {dimension_numbers = #tpu.dot_dimension_numbers<[1], [0], [0], [1], [0, 0, 1, 1], [], []>} : vector<16x16xf32>, vector<16x64xf32>, vector<16x64xf32> -> vector<16x64xf32>
    %c0_45 = arith.constant 0 : index
    %c0_46 = arith.constant 0 : index
    %c0_47 = arith.constant 0 : index
    %43 = vector.load %arg8[%c0_45, %c0_46, %c0_47] : memref<3x64x128xf32, #tpu.memory_space<vmem>>, vector<1x64x128xf32>
    %44 = vector.shape_cast %43 : vector<1x64x128xf32> to vector<64x128xf32>
    %cst_48 = arith.constant dense<0.000000e+00> : vector<16x128xf32>
    %45 = tpu.matmul %42, %44, %cst_48 {dimension_numbers = #tpu.dot_dimension_numbers<[1], [0], [0], [1], [0, 0, 1, 1], [], []>} : vector<16x64xf32>, vector<64x128xf32>, vector<16x128xf32> -> vector<16x128xf32>
    %c1_49 = arith.constant 1 : index
    %c0_50 = arith.constant 0 : index
    %c0_51 = arith.constant 0 : index
    %46 = vector.load %arg7[%c1_49, %c0_50, %c0_51] : memref<3x16x16xf32, #tpu.memory_space<vmem>>, vector<1x16x16xf32>
    %47 = vector.shape_cast %46 : vector<1x16x16xf32> to vector<16x16xf32>
    %cst_52 = arith.constant dense<0.000000e+00> : vector<16x64xf32>
    %48 = tpu.matmul %47, %39, %cst_52 {dimension_numbers = #tpu.dot_dimension_numbers<[1], [0], [0], [1], [0, 0, 1, 1], [], []>} : vector<16x16xf32>, vector<16x64xf32>, vector<16x64xf32> -> vector<16x64xf32>
    %c1_53 = arith.constant 1 : index
    %c0_54 = arith.constant 0 : index
    %c0_55 = arith.constant 0 : index
    %49 = vector.load %arg8[%c1_53, %c0_54, %c0_55] : memref<3x64x128xf32, #tpu.memory_space<vmem>>, vector<1x64x128xf32>
    %50 = vector.shape_cast %49 : vector<1x64x128xf32> to vector<64x128xf32>
    %cst_56 = arith.constant dense<0.000000e+00> : vector<16x128xf32>
    %51 = tpu.matmul %48, %50, %cst_56 {dimension_numbers = #tpu.dot_dimension_numbers<[1], [0], [0], [1], [0, 0, 1, 1], [], []>} : vector<16x64xf32>, vector<64x128xf32>, vector<16x128xf32> -> vector<16x128xf32>
    %52 = arith.addf %45, %51 : vector<16x128xf32>
    %c2_57 = arith.constant 2 : index
    %c0_58 = arith.constant 0 : index
    %c0_59 = arith.constant 0 : index
    %53 = vector.load %arg7[%c2_57, %c0_58, %c0_59] : memref<3x16x16xf32, #tpu.memory_space<vmem>>, vector<1x16x16xf32>
    %54 = vector.shape_cast %53 : vector<1x16x16xf32> to vector<16x16xf32>
    %cst_60 = arith.constant dense<0.000000e+00> : vector<16x64xf32>
    %55 = tpu.matmul %54, %39, %cst_60 {dimension_numbers = #tpu.dot_dimension_numbers<[1], [0], [0], [1], [0, 0, 1, 1], [], []>} : vector<16x16xf32>, vector<16x64xf32>, vector<16x64xf32> -> vector<16x64xf32>
    %c2_61 = arith.constant 2 : index
    %c0_62 = arith.constant 0 : index
    %c0_63 = arith.constant 0 : index
    %56 = vector.load %arg8[%c2_61, %c0_62, %c0_63] : memref<3x64x128xf32, #tpu.memory_space<vmem>>, vector<1x64x128xf32>
    %57 = vector.shape_cast %56 : vector<1x64x128xf32> to vector<64x128xf32>
    %cst_64 = arith.constant dense<0.000000e+00> : vector<16x128xf32>
    %58 = tpu.matmul %55, %57, %cst_64 {dimension_numbers = #tpu.dot_dimension_numbers<[1], [0], [0], [1], [0, 0, 1, 1], [], []>} : vector<16x64xf32>, vector<64x128xf32>, vector<16x128xf32> -> vector<16x128xf32>
    %59 = arith.addf %52, %58 : vector<16x128xf32>
    %c0_65 = arith.constant 0 : index
    %c0_66 = arith.constant 0 : index
    %60 = vector.load %arg9[%c0_65, %c0_66] : memref<1x128xf32, #tpu.memory_space<vmem>>, vector<1x128xf32>
    %61 = vector.broadcast %60 : vector<1x128xf32> to vector<16x128xf32>
    %62 = arith.addf %59, %61 : vector<16x128xf32>
    %c0_67 = arith.constant 0 : index
    %c0_68 = arith.constant 0 : index
    %c0_69 = arith.constant 0 : index
    %63 = vector.load %arg10[%c0_67, %c0_68, %c0_69] : memref<2x8x16xf32, #tpu.memory_space<vmem>>, vector<1x8x16xf32>
    %64 = vector.shape_cast %63 : vector<1x8x16xf32> to vector<8x16xf32>
    %cst_70 = arith.constant dense<0.000000e+00> : vector<8x128xf32>
    %65 = tpu.matmul %64, %62, %cst_70 {dimension_numbers = #tpu.dot_dimension_numbers<[1], [0], [0], [1], [0, 0, 1, 1], [], []>} : vector<8x16xf32>, vector<16x128xf32>, vector<8x128xf32> -> vector<8x128xf32>
    %c1_71 = arith.constant 1 : index
    %c0_72 = arith.constant 0 : index
    %c0_73 = arith.constant 0 : index
    %66 = vector.load %arg10[%c1_71, %c0_72, %c0_73] : memref<2x8x16xf32, #tpu.memory_space<vmem>>, vector<1x8x16xf32>
    %67 = vector.shape_cast %66 : vector<1x8x16xf32> to vector<8x16xf32>
    %cst_74 = arith.constant dense<0.000000e+00> : vector<8x128xf32>
    %68 = tpu.matmul %67, %62, %cst_74 {dimension_numbers = #tpu.dot_dimension_numbers<[1], [0], [0], [1], [0, 0, 1, 1], [], []>} : vector<8x16xf32>, vector<16x128xf32>, vector<8x128xf32> -> vector<8x128xf32>
    %69 = arith.maximumf %65, %68 : vector<8x128xf32>
    %c0_75 = arith.constant 0 : index
    %c0_76 = arith.constant 0 : index
    %c0_77 = arith.constant 0 : index
    %70 = vector.load %arg11[%c0_75, %c0_76, %c0_77] : memref<2x128x64xf32, #tpu.memory_space<vmem>>, vector<1x128x64xf32>
    %71 = vector.shape_cast %70 : vector<1x128x64xf32> to vector<128x64xf32>
    %cst_78 = arith.constant dense<0.000000e+00> : vector<8x64xf32>
    %72 = tpu.matmul %69, %71, %cst_78 {dimension_numbers = #tpu.dot_dimension_numbers<[1], [0], [0], [1], [0, 0, 1, 1], [], []>} : vector<8x128xf32>, vector<128x64xf32>, vector<8x64xf32> -> vector<8x64xf32>
    %c1_79 = arith.constant 1 : index
    %c0_80 = arith.constant 0 : index
    %c0_81 = arith.constant 0 : index
    %73 = vector.load %arg11[%c1_79, %c0_80, %c0_81] : memref<2x128x64xf32, #tpu.memory_space<vmem>>, vector<1x128x64xf32>
    %74 = vector.shape_cast %73 : vector<1x128x64xf32> to vector<128x64xf32>
    %cst_82 = arith.constant dense<0.000000e+00> : vector<8x64xf32>
    %75 = tpu.matmul %69, %74, %cst_82 {dimension_numbers = #tpu.dot_dimension_numbers<[1], [0], [0], [1], [0, 0, 1, 1], [], []>} : vector<8x128xf32>, vector<128x64xf32>, vector<8x64xf32> -> vector<8x64xf32>
    %76 = arith.maximumf %72, %75 : vector<8x64xf32>
    %cst_83 = arith.constant 0.000000e+00 : f32
    %77 = vector.broadcast %cst_83 : f32 to vector<8x64xf32>
    %78 = arith.maximumf %76, %77 : vector<8x64xf32>
    %c0_84 = arith.constant 0 : index
    %c0_85 = arith.constant 0 : index
    %c0_86 = arith.constant 0 : index
    %79 = vector.load %arg12[%c0_84, %c0_85, %c0_86] : memref<3x8x8xf32, #tpu.memory_space<vmem>>, vector<1x8x8xf32>
    %80 = vector.shape_cast %79 : vector<1x8x8xf32> to vector<8x8xf32>
    %cst_87 = arith.constant dense<0.000000e+00> : vector<8x64xf32>
    %81 = tpu.matmul %80, %78, %cst_87 {dimension_numbers = #tpu.dot_dimension_numbers<[1], [0], [0], [1], [0, 0, 1, 1], [], []>} : vector<8x8xf32>, vector<8x64xf32>, vector<8x64xf32> -> vector<8x64xf32>
    %c0_88 = arith.constant 0 : index
    %c0_89 = arith.constant 0 : index
    %c0_90 = arith.constant 0 : index
    %82 = vector.load %arg13[%c0_88, %c0_89, %c0_90] : memref<3x64x128xf32, #tpu.memory_space<vmem>>, vector<1x64x128xf32>
    %83 = vector.shape_cast %82 : vector<1x64x128xf32> to vector<64x128xf32>
    %cst_91 = arith.constant dense<0.000000e+00> : vector<8x128xf32>
    %84 = tpu.matmul %81, %83, %cst_91 {dimension_numbers = #tpu.dot_dimension_numbers<[1], [0], [0], [1], [0, 0, 1, 1], [], []>} : vector<8x64xf32>, vector<64x128xf32>, vector<8x128xf32> -> vector<8x128xf32>
    %c1_92 = arith.constant 1 : index
    %c0_93 = arith.constant 0 : index
    %c0_94 = arith.constant 0 : index
    %85 = vector.load %arg12[%c1_92, %c0_93, %c0_94] : memref<3x8x8xf32, #tpu.memory_space<vmem>>, vector<1x8x8xf32>
    %86 = vector.shape_cast %85 : vector<1x8x8xf32> to vector<8x8xf32>
    %cst_95 = arith.constant dense<0.000000e+00> : vector<8x64xf32>
    %87 = tpu.matmul %86, %78, %cst_95 {dimension_numbers = #tpu.dot_dimension_numbers<[1], [0], [0], [1], [0, 0, 1, 1], [], []>} : vector<8x8xf32>, vector<8x64xf32>, vector<8x64xf32> -> vector<8x64xf32>
    %c1_96 = arith.constant 1 : index
    %c0_97 = arith.constant 0 : index
    %c0_98 = arith.constant 0 : index
    %88 = vector.load %arg13[%c1_96, %c0_97, %c0_98] : memref<3x64x128xf32, #tpu.memory_space<vmem>>, vector<1x64x128xf32>
    %89 = vector.shape_cast %88 : vector<1x64x128xf32> to vector<64x128xf32>
    %cst_99 = arith.constant dense<0.000000e+00> : vector<8x128xf32>
    %90 = tpu.matmul %87, %89, %cst_99 {dimension_numbers = #tpu.dot_dimension_numbers<[1], [0], [0], [1], [0, 0, 1, 1], [], []>} : vector<8x64xf32>, vector<64x128xf32>, vector<8x128xf32> -> vector<8x128xf32>
    %91 = arith.addf %84, %90 : vector<8x128xf32>
    %c2_100 = arith.constant 2 : index
    %c0_101 = arith.constant 0 : index
    %c0_102 = arith.constant 0 : index
    %92 = vector.load %arg12[%c2_100, %c0_101, %c0_102] : memref<3x8x8xf32, #tpu.memory_space<vmem>>, vector<1x8x8xf32>
    %93 = vector.shape_cast %92 : vector<1x8x8xf32> to vector<8x8xf32>
    %cst_103 = arith.constant dense<0.000000e+00> : vector<8x64xf32>
    %94 = tpu.matmul %93, %78, %cst_103 {dimension_numbers = #tpu.dot_dimension_numbers<[1], [0], [0], [1], [0, 0, 1, 1], [], []>} : vector<8x8xf32>, vector<8x64xf32>, vector<8x64xf32> -> vector<8x64xf32>
    %c2_104 = arith.constant 2 : index
    %c0_105 = arith.constant 0 : index
    %c0_106 = arith.constant 0 : index
    %95 = vector.load %arg13[%c2_104, %c0_105, %c0_106] : memref<3x64x128xf32, #tpu.memory_space<vmem>>, vector<1x64x128xf32>
    %96 = vector.shape_cast %95 : vector<1x64x128xf32> to vector<64x128xf32>
    %cst_107 = arith.constant dense<0.000000e+00> : vector<8x128xf32>
    %97 = tpu.matmul %94, %96, %cst_107 {dimension_numbers = #tpu.dot_dimension_numbers<[1], [0], [0], [1], [0, 0, 1, 1], [], []>} : vector<8x64xf32>, vector<64x128xf32>, vector<8x128xf32> -> vector<8x128xf32>
    %98 = arith.addf %91, %97 : vector<8x128xf32>
    %c0_108 = arith.constant 0 : index
    %c0_109 = arith.constant 0 : index
    %99 = vector.load %arg14[%c0_108, %c0_109] : memref<1x128xf32, #tpu.memory_space<vmem>>, vector<1x128xf32>
    %100 = vector.broadcast %99 : vector<1x128xf32> to vector<8x128xf32>
    %101 = arith.addf %98, %100 : vector<8x128xf32>
    %cst_110 = arith.constant 0.000000e+00 : f32
    %102 = vector.broadcast %cst_110 : f32 to vector<8x128xf32>
    %103 = arith.maximumf %101, %102 : vector<8x128xf32>
    %c0_111 = arith.constant 0 : index
    %c0_112 = arith.constant 0 : index
    %c0_113 = arith.constant 0 : index
    %104 = vector.load %arg15[%c0_111, %c0_112, %c0_113] : memref<4x16x8xf32, #tpu.memory_space<vmem>>, vector<1x16x8xf32>
    %105 = vector.shape_cast %104 : vector<1x16x8xf32> to vector<16x8xf32>
    %cst_114 = arith.constant dense<0.000000e+00> : vector<16x128xf32>
    %106 = tpu.matmul %105, %103, %cst_114 {dimension_numbers = #tpu.dot_dimension_numbers<[1], [0], [0], [1], [0, 0, 1, 1], [], []>} : vector<16x8xf32>, vector<8x128xf32>, vector<16x128xf32> -> vector<16x128xf32>
    %c0_115 = arith.constant 0 : index
    %c0_116 = arith.constant 0 : index
    %c0_117 = arith.constant 0 : index
    %107 = vector.load %arg16[%c0_115, %c0_116, %c0_117] : memref<4x128x128xf32, #tpu.memory_space<vmem>>, vector<1x128x128xf32>
    %108 = vector.shape_cast %107 : vector<1x128x128xf32> to vector<128x128xf32>
    %cst_118 = arith.constant dense<0.000000e+00> : vector<16x128xf32>
    %109 = tpu.matmul %106, %108, %cst_118 {dimension_numbers = #tpu.dot_dimension_numbers<[1], [0], [0], [1], [0, 0, 1, 1], [], []>} : vector<16x128xf32>, vector<128x128xf32>, vector<16x128xf32> -> vector<16x128xf32>
    %c1_119 = arith.constant 1 : index
    %c0_120 = arith.constant 0 : index
    %c0_121 = arith.constant 0 : index
    %110 = vector.load %arg15[%c1_119, %c0_120, %c0_121] : memref<4x16x8xf32, #tpu.memory_space<vmem>>, vector<1x16x8xf32>
    %111 = vector.shape_cast %110 : vector<1x16x8xf32> to vector<16x8xf32>
    %cst_122 = arith.constant dense<0.000000e+00> : vector<16x128xf32>
    %112 = tpu.matmul %111, %103, %cst_122 {dimension_numbers = #tpu.dot_dimension_numbers<[1], [0], [0], [1], [0, 0, 1, 1], [], []>} : vector<16x8xf32>, vector<8x128xf32>, vector<16x128xf32> -> vector<16x128xf32>
    %c1_123 = arith.constant 1 : index
    %c0_124 = arith.constant 0 : index
    %c0_125 = arith.constant 0 : index
    %113 = vector.load %arg16[%c1_123, %c0_124, %c0_125] : memref<4x128x128xf32, #tpu.memory_space<vmem>>, vector<1x128x128xf32>
    %114 = vector.shape_cast %113 : vector<1x128x128xf32> to vector<128x128xf32>
    %cst_126 = arith.constant dense<0.000000e+00> : vector<16x128xf32>
    %115 = tpu.matmul %112, %114, %cst_126 {dimension_numbers = #tpu.dot_dimension_numbers<[1], [0], [0], [1], [0, 0, 1, 1], [], []>} : vector<16x128xf32>, vector<128x128xf32>, vector<16x128xf32> -> vector<16x128xf32>
    %116 = arith.addf %109, %115 : vector<16x128xf32>
    %c2_127 = arith.constant 2 : index
    %c0_128 = arith.constant 0 : index
    %c0_129 = arith.constant 0 : index
    %117 = vector.load %arg15[%c2_127, %c0_128, %c0_129] : memref<4x16x8xf32, #tpu.memory_space<vmem>>, vector<1x16x8xf32>
    %118 = vector.shape_cast %117 : vector<1x16x8xf32> to vector<16x8xf32>
    %cst_130 = arith.constant dense<0.000000e+00> : vector<16x128xf32>
    %119 = tpu.matmul %118, %103, %cst_130 {dimension_numbers = #tpu.dot_dimension_numbers<[1], [0], [0], [1], [0, 0, 1, 1], [], []>} : vector<16x8xf32>, vector<8x128xf32>, vector<16x128xf32> -> vector<16x128xf32>
    %c2_131 = arith.constant 2 : index
    %c0_132 = arith.constant 0 : index
    %c0_133 = arith.constant 0 : index
    %120 = vector.load %arg16[%c2_131, %c0_132, %c0_133] : memref<4x128x128xf32, #tpu.memory_space<vmem>>, vector<1x128x128xf32>
    %121 = vector.shape_cast %120 : vector<1x128x128xf32> to vector<128x128xf32>
    %cst_134 = arith.constant dense<0.000000e+00> : vector<16x128xf32>
    %122 = tpu.matmul %119, %121, %cst_134 {dimension_numbers = #tpu.dot_dimension_numbers<[1], [0], [0], [1], [0, 0, 1, 1], [], []>} : vector<16x128xf32>, vector<128x128xf32>, vector<16x128xf32> -> vector<16x128xf32>
    %123 = arith.addf %116, %122 : vector<16x128xf32>
    %c3 = arith.constant 3 : index
    %c0_135 = arith.constant 0 : index
    %c0_136 = arith.constant 0 : index
    %124 = vector.load %arg15[%c3, %c0_135, %c0_136] : memref<4x16x8xf32, #tpu.memory_space<vmem>>, vector<1x16x8xf32>
    %125 = vector.shape_cast %124 : vector<1x16x8xf32> to vector<16x8xf32>
    %cst_137 = arith.constant dense<0.000000e+00> : vector<16x128xf32>
    %126 = tpu.matmul %125, %103, %cst_137 {dimension_numbers = #tpu.dot_dimension_numbers<[1], [0], [0], [1], [0, 0, 1, 1], [], []>} : vector<16x8xf32>, vector<8x128xf32>, vector<16x128xf32> -> vector<16x128xf32>
    %c3_138 = arith.constant 3 : index
    %c0_139 = arith.constant 0 : index
    %c0_140 = arith.constant 0 : index
    %127 = vector.load %arg16[%c3_138, %c0_139, %c0_140] : memref<4x128x128xf32, #tpu.memory_space<vmem>>, vector<1x128x128xf32>
    %128 = vector.shape_cast %127 : vector<1x128x128xf32> to vector<128x128xf32>
    %cst_141 = arith.constant dense<0.000000e+00> : vector<16x128xf32>
    %129 = tpu.matmul %126, %128, %cst_141 {dimension_numbers = #tpu.dot_dimension_numbers<[1], [0], [0], [1], [0, 0, 1, 1], [], []>} : vector<16x128xf32>, vector<128x128xf32>, vector<16x128xf32> -> vector<16x128xf32>
    %130 = arith.addf %123, %129 : vector<16x128xf32>
    %c0_142 = arith.constant 0 : index
    %c0_143 = arith.constant 0 : index
    %131 = vector.load %arg17[%c0_142, %c0_143] : memref<1x128xf32, #tpu.memory_space<vmem>>, vector<1x128xf32>
    %132 = vector.broadcast %131 : vector<1x128xf32> to vector<16x128xf32>
    %133 = arith.addf %130, %132 : vector<16x128xf32>
    %cst_144 = arith.constant 0.000000e+00 : f32
    %134 = vector.broadcast %cst_144 : f32 to vector<16x128xf32>
    %135 = arith.maximumf %133, %134 : vector<16x128xf32>
    %c0_145 = arith.constant 0 : index
    %c0_146 = arith.constant 0 : index
    %c0_147 = arith.constant 0 : index
    %136 = vector.load %arg18[%c0_145, %c0_146, %c0_147] : memref<4x32x16xf32, #tpu.memory_space<vmem>>, vector<1x32x16xf32>
    %137 = vector.shape_cast %136 : vector<1x32x16xf32> to vector<32x16xf32>
    %cst_148 = arith.constant dense<0.000000e+00> : vector<32x128xf32>
    %138 = tpu.matmul %137, %135, %cst_148 {dimension_numbers = #tpu.dot_dimension_numbers<[1], [0], [0], [1], [0, 0, 1, 1], [], []>} : vector<32x16xf32>, vector<16x128xf32>, vector<32x128xf32> -> vector<32x128xf32>
    %c0_149 = arith.constant 0 : index
    %c0_150 = arith.constant 0 : index
    %c0_151 = arith.constant 0 : index
    %139 = vector.load %arg19[%c0_149, %c0_150, %c0_151] : memref<4x128x128xf32, #tpu.memory_space<vmem>>, vector<1x128x128xf32>
    %140 = vector.shape_cast %139 : vector<1x128x128xf32> to vector<128x128xf32>
    %cst_152 = arith.constant dense<0.000000e+00> : vector<32x128xf32>
    %141 = tpu.matmul %138, %140, %cst_152 {dimension_numbers = #tpu.dot_dimension_numbers<[1], [0], [0], [1], [0, 0, 1, 1], [], []>} : vector<32x128xf32>, vector<128x128xf32>, vector<32x128xf32> -> vector<32x128xf32>
    %c1_153 = arith.constant 1 : index
    %c0_154 = arith.constant 0 : index
    %c0_155 = arith.constant 0 : index
    %142 = vector.load %arg18[%c1_153, %c0_154, %c0_155] : memref<4x32x16xf32, #tpu.memory_space<vmem>>, vector<1x32x16xf32>
    %143 = vector.shape_cast %142 : vector<1x32x16xf32> to vector<32x16xf32>
    %cst_156 = arith.constant dense<0.000000e+00> : vector<32x128xf32>
    %144 = tpu.matmul %143, %135, %cst_156 {dimension_numbers = #tpu.dot_dimension_numbers<[1], [0], [0], [1], [0, 0, 1, 1], [], []>} : vector<32x16xf32>, vector<16x128xf32>, vector<32x128xf32> -> vector<32x128xf32>
    %c1_157 = arith.constant 1 : index
    %c0_158 = arith.constant 0 : index
    %c0_159 = arith.constant 0 : index
    %145 = vector.load %arg19[%c1_157, %c0_158, %c0_159] : memref<4x128x128xf32, #tpu.memory_space<vmem>>, vector<1x128x128xf32>
    %146 = vector.shape_cast %145 : vector<1x128x128xf32> to vector<128x128xf32>
    %cst_160 = arith.constant dense<0.000000e+00> : vector<32x128xf32>
    %147 = tpu.matmul %144, %146, %cst_160 {dimension_numbers = #tpu.dot_dimension_numbers<[1], [0], [0], [1], [0, 0, 1, 1], [], []>} : vector<32x128xf32>, vector<128x128xf32>, vector<32x128xf32> -> vector<32x128xf32>
    %148 = arith.addf %141, %147 : vector<32x128xf32>
    %c2_161 = arith.constant 2 : index
    %c0_162 = arith.constant 0 : index
    %c0_163 = arith.constant 0 : index
    %149 = vector.load %arg18[%c2_161, %c0_162, %c0_163] : memref<4x32x16xf32, #tpu.memory_space<vmem>>, vector<1x32x16xf32>
    %150 = vector.shape_cast %149 : vector<1x32x16xf32> to vector<32x16xf32>
    %cst_164 = arith.constant dense<0.000000e+00> : vector<32x128xf32>
    %151 = tpu.matmul %150, %135, %cst_164 {dimension_numbers = #tpu.dot_dimension_numbers<[1], [0], [0], [1], [0, 0, 1, 1], [], []>} : vector<32x16xf32>, vector<16x128xf32>, vector<32x128xf32> -> vector<32x128xf32>
    %c2_165 = arith.constant 2 : index
    %c0_166 = arith.constant 0 : index
    %c0_167 = arith.constant 0 : index
    %152 = vector.load %arg19[%c2_165, %c0_166, %c0_167] : memref<4x128x128xf32, #tpu.memory_space<vmem>>, vector<1x128x128xf32>
    %153 = vector.shape_cast %152 : vector<1x128x128xf32> to vector<128x128xf32>
    %cst_168 = arith.constant dense<0.000000e+00> : vector<32x128xf32>
    %154 = tpu.matmul %151, %153, %cst_168 {dimension_numbers = #tpu.dot_dimension_numbers<[1], [0], [0], [1], [0, 0, 1, 1], [], []>} : vector<32x128xf32>, vector<128x128xf32>, vector<32x128xf32> -> vector<32x128xf32>
    %155 = arith.addf %148, %154 : vector<32x128xf32>
    %c3_169 = arith.constant 3 : index
    %c0_170 = arith.constant 0 : index
    %c0_171 = arith.constant 0 : index
    %156 = vector.load %arg18[%c3_169, %c0_170, %c0_171] : memref<4x32x16xf32, #tpu.memory_space<vmem>>, vector<1x32x16xf32>
    %157 = vector.shape_cast %156 : vector<1x32x16xf32> to vector<32x16xf32>
    %cst_172 = arith.constant dense<0.000000e+00> : vector<32x128xf32>
    %158 = tpu.matmul %157, %135, %cst_172 {dimension_numbers = #tpu.dot_dimension_numbers<[1], [0], [0], [1], [0, 0, 1, 1], [], []>} : vector<32x16xf32>, vector<16x128xf32>, vector<32x128xf32> -> vector<32x128xf32>
    %c3_173 = arith.constant 3 : index
    %c0_174 = arith.constant 0 : index
    %c0_175 = arith.constant 0 : index
    %159 = vector.load %arg19[%c3_173, %c0_174, %c0_175] : memref<4x128x128xf32, #tpu.memory_space<vmem>>, vector<1x128x128xf32>
    %160 = vector.shape_cast %159 : vector<1x128x128xf32> to vector<128x128xf32>
    %cst_176 = arith.constant dense<0.000000e+00> : vector<32x128xf32>
    %161 = tpu.matmul %158, %160, %cst_176 {dimension_numbers = #tpu.dot_dimension_numbers<[1], [0], [0], [1], [0, 0, 1, 1], [], []>} : vector<32x128xf32>, vector<128x128xf32>, vector<32x128xf32> -> vector<32x128xf32>
    %162 = arith.addf %155, %161 : vector<32x128xf32>
    %c0_177 = arith.constant 0 : index
    %c0_178 = arith.constant 0 : index
    %163 = vector.load %arg20[%c0_177, %c0_178] : memref<1x128xf32, #tpu.memory_space<vmem>>, vector<1x128xf32>
    %164 = vector.broadcast %163 : vector<1x128xf32> to vector<32x128xf32>
    %165 = arith.addf %162, %164 : vector<32x128xf32>
    %cst_179 = arith.constant 0.000000e+00 : f32
    %166 = vector.broadcast %cst_179 : f32 to vector<32x128xf32>
    %167 = arith.maximumf %165, %166 : vector<32x128xf32>
    %c0_180 = arith.constant 0 : index
    %c0_181 = arith.constant 0 : index
    %168 = vector.load %arg21[%c0_180, %c0_181] : memref<128x128xf32, #tpu.memory_space<vmem>>, vector<128x128xf32>
    %cst_182 = arith.constant dense<0.000000e+00> : vector<32x128xf32>
    %169 = tpu.matmul %167, %168, %cst_182 {dimension_numbers = #tpu.dot_dimension_numbers<[1], [0], [0], [1], [0, 0, 1, 1], [], []>} : vector<32x128xf32>, vector<128x128xf32>, vector<32x128xf32> -> vector<32x128xf32>
    %c0_183 = arith.constant 0 : index
    %c0_184 = arith.constant 0 : index
    %170 = vector.load %arg22[%c0_183, %c0_184] : memref<1x128xf32, #tpu.memory_space<vmem>>, vector<1x128xf32>
    %171 = vector.broadcast %170 : vector<1x128xf32> to vector<32x128xf32>
    %172 = arith.addf %169, %171 : vector<32x128xf32>
    %c0_185 = arith.constant 0 : index
    %c0_186 = arith.constant 0 : index
    %173 = vector.load %arg23[%c0_185, %c0_186] : memref<32x128xf32, #tpu.memory_space<vmem>>, vector<32x128xf32>
    tpu.vector_store %arg23[%c0_185, %c0_186], %172 {strides = array<i32>} : memref<32x128xf32, #tpu.memory_space<vmem>>, vector<32x128xf32>,
    return
  }
  func.func @transform_0(%arg0: i32) -> (i32, i32) {
    %c0_i32 = arith.constant 0 : i32
    %c0_i32_0 = arith.constant 0 : i32
    %c0_i32_1 = arith.constant 0 : i32
    return %c0_i32, %c0_i32_0 : i32, i32
  }
  func.func @transform_1(%arg0: i32) -> (i32, i32, i32) {
    %c0_i32 = arith.constant 0 : i32
    %c0_i32_0 = arith.constant 0 : i32
    %c0_i32_1 = arith.constant 0 : i32
    %c0_i32_2 = arith.constant 0 : i32
    return %c0_i32, %c0_i32_0, %c0_i32_1 : i32, i32, i32
  }
  func.func @transform_2(%arg0: i32) -> (i32, i32, i32) {
    %c0_i32 = arith.constant 0 : i32
    %c0_i32_0 = arith.constant 0 : i32
    %c0_i32_1 = arith.constant 0 : i32
    %c0_i32_2 = arith.constant 0 : i32
    return %c0_i32, %c0_i32_0, %c0_i32_1 : i32, i32, i32
  }
  func.func @transform_3(%arg0: i32) -> (i32, i32) {
    %c0_i32 = arith.constant 0 : i32
    %c0_i32_0 = arith.constant 0 : i32
    %c0_i32_1 = arith.constant 0 : i32
    return %c0_i32, %c0_i32_0 : i32, i32
  }
  func.func @transform_4(%arg0: i32) -> (i32, i32, i32) {
    %c0_i32 = arith.constant 0 : i32
    %c0_i32_0 = arith.constant 0 : i32
    %c0_i32_1 = arith.constant 0 : i32
    %c0_i32_2 = arith.constant 0 : i32
    return %c0_i32, %c0_i32_0, %c0_i32_1 : i32, i32, i32
  }
  func.func @transform_5(%arg0: i32) -> (i32, i32, i32) {
    %c0_i32 = arith.constant 0 : i32
    %c0_i32_0 = arith.constant 0 : i32
    %c0_i32_1 = arith.constant 0 : i32
    %c0_i32_2 = arith.constant 0 : i32
    return %c0_i32, %c0_i32_0, %c0_i32_1 : i32, i32, i32
  }
  func.func @transform_6(%arg0: i32) -> (i32, i32, i32) {
    %c0_i32 = arith.constant 0 : i32
    %c0_i32_0 = arith.constant 0 : i32
    %c0_i32_1 = arith.constant 0 : i32
    %c0_i32_2 = arith.constant 0 : i32
    return %c0_i32, %c0_i32_0, %c0_i32_1 : i32, i32, i32
  }
  func.func @transform_7(%arg0: i32) -> (i32, i32, i32) {
    %c0_i32 = arith.constant 0 : i32
    %c0_i32_0 = arith.constant 0 : i32
    %c0_i32_1 = arith.constant 0 : i32
    %c0_i32_2 = arith.constant 0 : i32
    return %c0_i32, %c0_i32_0, %c0_i32_1 : i32, i32, i32
  }
  func.func @transform_8(%arg0: i32) -> (i32, i32) {
    %c0_i32 = arith.constant 0 : i32
    %c0_i32_0 = arith.constant 0 : i32
    %c0_i32_1 = arith.constant 0 : i32
    return %c0_i32, %c0_i32_0 : i32, i32
  }
  func.func @transform_9(%arg0: i32) -> (i32, i32, i32) {
    %c0_i32 = arith.constant 0 : i32
    %c0_i32_0 = arith.constant 0 : i32
    %c0_i32_1 = arith.constant 0 : i32
    %c0_i32_2 = arith.constant 0 : i32
    return %c0_i32, %c0_i32_0, %c0_i32_1 : i32, i32, i32
  }
  func.func @transform_10(%arg0: i32) -> (i32, i32, i32) {
    %c0_i32 = arith.constant 0 : i32
    %c0_i32_0 = arith.constant 0 : i32
    %c0_i32_1 = arith.constant 0 : i32
    %c0_i32_2 = arith.constant 0 : i32
    return %c0_i32, %c0_i32_0, %c0_i32_1 : i32, i32, i32
  }
  func.func @transform_11(%arg0: i32) -> (i32, i32, i32) {
    %c0_i32 = arith.constant 0 : i32
    %c0_i32_0 = arith.constant 0 : i32
    %c0_i32_1 = arith.constant 0 : i32
    %c0_i32_2 = arith.constant 0 : i32
    return %c0_i32, %c0_i32_0, %c0_i32_1 : i32, i32, i32
  }
  func.func @transform_12(%arg0: i32) -> (i32, i32, i32) {
    %c0_i32 = arith.constant 0 : i32
    %c0_i32_0 = arith.constant 0 : i32
    %c0_i32_1 = arith.constant 0 : i32
    %c0_i32_2 = arith.constant 0 : i32
    return %c0_i32, %c0_i32_0, %c0_i32_1 : i32, i32, i32
  }
  func.func @transform_13(%arg0: i32) -> (i32, i32) {
    %c0_i32 = arith.constant 0 : i32
    %c0_i32_0 = arith.constant 0 : i32
    %c0_i32_1 = arith.constant 0 : i32
    return %c0_i32, %c0_i32_0 : i32, i32
  }
  func.func @transform_14(%arg0: i32) -> (i32, i32, i32) {
    %c0_i32 = arith.constant 0 : i32
    %c0_i32_0 = arith.constant 0 : i32
    %c0_i32_1 = arith.constant 0 : i32
    %c0_i32_2 = arith.constant 0 : i32
    return %c0_i32, %c0_i32_0, %c0_i32_1 : i32, i32, i32
  }
  func.func @transform_15(%arg0: i32) -> (i32, i32, i32) {
    %c0_i32 = arith.constant 0 : i32
    %c0_i32_0 = arith.constant 0 : i32
    %c0_i32_1 = arith.constant 0 : i32
    %c0_i32_2 = arith.constant 0 : i32
    return %c0_i32, %c0_i32_0, %c0_i32_1 : i32, i32, i32
  }
  func.func @transform_16(%arg0: i32) -> (i32, i32) {
    %c0_i32 = arith.constant 0 : i32
    %c0_i32_0 = arith.constant 0 : i32
    %c0_i32_1 = arith.constant 0 : i32
    return %c0_i32, %c0_i32_0 : i32, i32
  }
  func.func @transform_17(%arg0: i32) -> (i32, i32, i32) {
    %c0_i32 = arith.constant 0 : i32
    %c0_i32_0 = arith.constant 0 : i32
    %c0_i32_1 = arith.constant 0 : i32
    %c0_i32_2 = arith.constant 0 : i32
    return %c0_i32, %c0_i32_0, %c0_i32_1 : i32, i32, i32
  }
  func.func @transform_18(%arg0: i32) -> (i32, i32, i32) {
    %c0_i32 = arith.constant 0 : i32
    %c0_i32_0 = arith.constant 0 : i32
    %c0_i32_1 = arith.constant 0 : i32
    %c0_i32_2 = arith.constant 0 : i32
    return %c0_i32, %c0_i32_0, %c0_i32_1 : i32, i32, i32
  }
  func.func @transform_19(%arg0: i32) -> (i32, i32) {
    %c0_i32 = arith.constant 0 : i32
    %c0_i32_0 = arith.constant 0 : i32
    %c0_i32_1 = arith.constant 0 : i32
    return %c0_i32, %c0_i32_0 : i32, i32
  }
  func.func @transform_20(%arg0: i32) -> (i32, i32) {
    %c0_i32 = arith.constant 0 : i32
    %c0_i32_0 = arith.constant 0 : i32
    %c0_i32_1 = arith.constant 0 : i32
    return %c0_i32, %c0_i32_0 : i32, i32
  }
  func.func @transform_21(%arg0: i32) -> (i32, i32) {
    %c0_i32 = arith.constant 0 : i32
    %c0_i32_0 = arith.constant 0 : i32
    %c0_i32_1 = arith.constant 0 : i32
    return %c0_i32, %c0_i32_0 : i32, i32
  }
  func.func @transform_22(%arg0: i32) -> (i32, i32) {
    %c0_i32 = arith.constant 0 : i32
    %c0_i32_0 = arith.constant 0 : i32
    %c0_i32_1 = arith.constant 0 : i32
    return %c0_i32, %c0_i32_0 : i32, i32
  }
}

</mosaic_0001>

<bundles_post_ra>
// kernel: net_forward.1
= control target key start
LH: loop header
LB: loop body
LE: loop exit
PB: predicated region body
PF: predicated region fallthrough
CT: control target
= control target key end

     0   :  { %s7640_s0 = inlined_call_operand.vmem [shape: f32[32,32], index: 0, kind: input, shape index: {}]   ;;  %s7641_s1 = inlined_call_operand.hbm [shape: f32[3,32,32], index: 1, kind: input, shape index: {}]   ;;  %s7642_s2 = inlined_call_operand.hbm [shape: f32[3,32,128], index: 2, kind: input, shape index: {}]   ;;  %s7643_s3 = inlined_call_operand.vmem [shape: f32[1,128], index: 3, kind: input, shape index: {}]   ;;  %s7644_s4 = inlined_call_operand.hbm [shape: f32[2,16,32], index: 4, kind: input, shape index: {}]   ;;  %s7645_s5 = inlined_call_operand.vmem [shape: f32[2,128,64], index: 5, kind: input, shape index: {}]   ;;  %s7646_s6 = inlined_call_operand.hbm [shape: f32[3,16,16], index: 6, kind: input, shape index: {}]   ;;  %s7647_s7 = inlined_call_operand.vmem [shape: f32[3,64,128], index: 7, kind: input, shape index: {}]   ;;  %s7648_s8 = inlined_call_operand.vmem [shape: f32[1,128], index: 8, kind: input, shape index: {}]   ;;  %s7649_s9 = inlined_call_operand.hbm [shape: f32[2,8,16], index: 9, kind: input, shape index: {}]   ;;  %s7650_s10 = inlined_call_operand.vmem [shape: f32[2,128,64], index: 10, kind: input, shape index: {}]   ;;  %s7651_s11 = inlined_call_operand.hbm [shape: f32[3,8,8], index: 11, kind: input, shape index: {}]   ;;  %s7652_s12 = inlined_call_operand.hbm [shape: f32[3,64,128], index: 12, kind: input, shape index: {}]   ;;  %s7653_s13 = inlined_call_operand.vmem [shape: f32[1,128], index: 13, kind: input, shape index: {}]   ;;  %s7654_s14 = inlined_call_operand.vmem [shape: f32[4,16,8], index: 14, kind: input, shape index: {}]   ;;  %s7655_s15 = inlined_call_operand.vmem [shape: f32[4,128,128], index: 15, kind: input, shape index: {}]   ;;  %s7656_s16 = inlined_call_operand.vmem [shape: f32[1,128], index: 16, kind: input, shape index: {}]   ;;  %s7657_s17 = inlined_call_operand.vmem [shape: f32[4,32,16], index: 17, kind: input, shape index: {}]   ;;  %s7658_s18 = inlined_call_operand.vmem [shape: f32[4,128,128], index: 18, kind: input, shape index: {}]   ;;  %s7659_s19 = inlined_call_operand.vmem [shape: f32[1,128], index: 19, kind: input, shape index: {}]   ;;  %s7660_s20 = inlined_call_operand.hbm [shape: f32[128,128], index: 20, kind: input, shape index: {}]   ;;  %s7661_s21 = inlined_call_operand.vmem [shape: f32[1,128], index: 21, kind: input, shape index: {}]   ;;  %s7662_s22 = inlined_call_operand.vmem [shape: f32[32,128], index: 22, kind: output, shape index: {}]  }
   0x1   :  { %7670 = sst [smem:[#allocation20_spill]] %s7640_s0 }
   0x2   :  { %7671 = sst [smem:[#allocation21_spill]] %s7641_s1 }
   0x3   :  { %7672 = sst [smem:[#allocation22_spill]] %s7642_s2 }
   0x4   :  { %7673 = sst [smem:[#allocation23_spill]] %s7643_s3 }
   0x5   :  { %7674 = sst [smem:[#allocation24_spill]] %s7644_s4 }
   0x6   :  { %7675 = sst [smem:[#allocation25_spill]] %s7645_s5 }
   0x7   :  { %7676 = sst [smem:[#allocation26_spill]] %s7646_s6 }
   0x8   :  { %7677 = sst [smem:[#allocation27_spill]] %s7661_s21 }
   0x9   :  { %7678 = sst [smem:[#allocation28_spill]] %s7662_s22 }
   0xa   :  { %27 = vsyncpa [#allocation3], 0 }
   0xb   :  { %28 = vsyncpa [#allocation5], 0 }
   0xc   :  { %29 = vsyncpa [#allocation8], 0 }
   0xd   :  { %30 = vsyncpa [#allocation11], 0 }
   0xe   :  { %31 = vsyncpa [#allocation14], 0  ;;  %s6449_s3 = smov [#allocation4]   ;;  %s6450_s29 = smov [#allocation7]  }
   0xf   :  { %s51_s28 = sshll.u32 %s6449_s3, 4  ;;  %s79_s30 = sshll.u32 %s6450_s29, 4  ;;  %s52_s28 = int_to_ptr.vmem [resolvable:$true] %s51_s28  ;;  %s6577_s30 = int_to_ptr.vmem [resolvable:$true] %s79_s30 }
  0x10   :  { %s7679_s23 = sld [smem:[#allocation22_spill]] }
  0x16   :  { %s6263_s1 = scalar_lea.hbm %s7679_s23, 1536 }
  0x17   :  { %p6264_p0 = scmp.ne.s32.totalorder %s7679_s23, %s6263_s1  ;;  %p6267_p1 = scmp.lt.u32.totalorder %s6263_s1, %s7679_s23 }
  0x19   :  { %p6269_p2 = pnand %p6267_p1, %p6264_p0 }
  0x1b   :  { %6272 = shalt.err (!%p6269_p2)
}
  0x1c   :  { %s6273_s26 = scalar_lea.vmem %s52_s28, 1536  ;;  %p6278_p4 = scmp.lt.s32.totalorder %s52_s28, %s52_s28 }
  0x1d   :  { %p6274_p3 = scmp.ne.s32.totalorder %s52_s28, %s6273_s26  ;;  %p6279_p5 = scmp.lt.s32.totalorder %s6273_s26, %s6273_s26 }
  0x1f   :  { %p6280_p6 = por %p6279_p5, %p6278_p4 }
  0x21   :  { %p6281_p7 = pnand %p6280_p6, %p6274_p3 }
  0x23   :  { %6284 = shalt.err (!%p6281_p7)
}
  0x24   :  { %s6451_s2 = smov 128   ;;  %s6452_s27 = smov 8  }
  0x25   :  { %57 = dma.hbm_to_vmem [thread:$0]  %s7679_s23, 1536, %s52_s28, [#allocation5], %s6451_s2, %s6451_s2, %s6452_s27  }
  0x26   :  { %s7680_s1 = sld [smem:[#allocation26_spill]] }
  0x2c   :  { %s6285_s5 = scalar_lea.hbm %s7680_s1, 768 }
  0x2d   :  { %p6286_p8 = scmp.ne.s32.totalorder %s7680_s1, %s6285_s5  ;;  %p6289_p9 = scmp.lt.u32.totalorder %s6285_s5, %s7680_s1 }
  0x2f   :  { %p6291_p10 = pnand %p6289_p9, %p6286_p8 }
  0x31   :  { %6294 = shalt.err (!%p6291_p10)
}
  0x32   :  { %s6295_s22 = scalar_lea.vmem %s6577_s30, 768  ;;  %p6300_p12 = scmp.lt.s32.totalorder %s6577_s30, %s6577_s30 }
  0x33   :  { %p6296_p11 = scmp.ne.s32.totalorder %s6577_s30, %s6295_s22  ;;  %p6301_p13 = scmp.lt.s32.totalorder %s6295_s22, %s6295_s22 }
  0x35   :  { %p6302_p0 = por %p6301_p13, %p6300_p12 }
  0x37   :  { %p6303_p1 = pnand %p6302_p0, %p6296_p11 }
  0x39   :  { %6306 = shalt.err (!%p6303_p1)
}
  0x3a   :  { %85 = dma.hbm_to_vmem [thread:$0]  %s7680_s1, 768, %s6577_s30, [#allocation8], %s6451_s2, %s6451_s2, %s6452_s27  }
  0x3b   :  { %s6453_s3 = smov [#allocation10]   ;;  %s6454_s4 = smov [#allocation2]  }
  0x3c   :  { %s109_s29 = sshll.u32 %s6453_s3, 4  ;;  %s39_s0 = sshll.u32 %s6454_s4, 4  ;;  %s110_s29 = int_to_ptr.vmem [resolvable:$true] %s109_s29  ;;  %s6614_s0 = int_to_ptr.vmem [resolvable:$true] %s39_s0 }
  0x3d   :  { %s6307_s24 = scalar_lea.hbm %s7651_s11, 384 }
  0x3e   :  { %p6308_p2 = scmp.ne.s32.totalorder %s7651_s11, %s6307_s24  ;;  %p6311_p3 = scmp.lt.u32.totalorder %s6307_s24, %s7651_s11 }
  0x40   :  { %p6313_p4 = pnand %p6311_p3, %p6308_p2 }
  0x42   :  { %6316 = shalt.err (!%p6313_p4)
}
  0x43   :  { %s6317_s30 = scalar_lea.vmem %s110_s29, 384  ;;  %p6322_p6 = scmp.lt.s32.totalorder %s110_s29, %s110_s29 }
  0x44   :  { %p6318_p5 = scmp.ne.s32.totalorder %s110_s29, %s6317_s30  ;;  %p6323_p7 = scmp.lt.s32.totalorder %s6317_s30, %s6317_s30 }
  0x46   :  { %p6324_p8 = por %p6323_p7, %p6322_p6 }
  0x48   :  { %p6325_p9 = pnand %p6324_p8, %p6318_p5 }
  0x4a   :  { %6328 = shalt.err (!%p6325_p9)
}
  0x4b   :  { %115 = dma.hbm_to_vmem [thread:$0]  %s7651_s11, 384, %s110_s29, [#allocation11], %s6451_s2, %s6451_s2, %s6452_s27  }
  0x4c   :  { %s7681_s21 = sld [smem:[#allocation21_spill]] }
  0x52   :  { %s6329_s4 = scalar_lea.hbm %s7681_s21, 1536 }
  0x53   :  { %p6330_p10 = scmp.ne.s32.totalorder %s7681_s21, %s6329_s4  ;;  %p6333_p11 = scmp.lt.u32.totalorder %s6329_s4, %s7681_s21 }
  0x55   :  { %p6335_p12 = pnand %p6333_p11, %p6330_p10 }
  0x57   :  { %6338 = shalt.err (!%p6335_p12)
}
  0x58   :  { %s6339_s25 = scalar_lea.vmem %s6614_s0, 1536  ;;  %p6344_p0 = scmp.lt.s32.totalorder %s6614_s0, %s6614_s0 }
  0x59   :  { %p6340_p13 = scmp.ne.s32.totalorder %s6614_s0, %s6339_s25  ;;  %p6345_p1 = scmp.lt.s32.totalorder %s6339_s25, %s6339_s25 }
  0x5b   :  { %p6346_p2 = por %p6345_p1, %p6344_p0 }
  0x5d   :  { %p6347_p3 = pnand %p6346_p2, %p6340_p13 }
  0x5f   :  { %6350 = shalt.err (!%p6347_p3)
}
  0x60   :  { %45 = dma.hbm_to_vmem [thread:$0]  %s7681_s21, 1536, %s6614_s0, [#allocation3], %s6451_s2, %s6451_s2, %s6452_s27  }
  0x61   :  { %s6455_s26 = smov [#allocation6]   ;;  %s6456_s1 = smov [#allocation9]  }
  0x62   :  { %s65_s30 = sshll.u32 %s6455_s26, 4  ;;  %s95_s28 = sshll.u32 %s6456_s1, 4  ;;  %s66_s30 = int_to_ptr.vmem [resolvable:$true] %s65_s30  ;;  %s6651_s28 = int_to_ptr.vmem [resolvable:$true] %s95_s28 }
  0x63   :  { %s7682_s4 = sld [smem:[#allocation24_spill]] }
  0x69   :  { %s6351_s5 = scalar_lea.hbm %s7682_s4, 512 }
  0x6a   :  { %p6352_p4 = scmp.ne.s32.totalorder %s7682_s4, %s6351_s5  ;;  %p6355_p5 = scmp.lt.u32.totalorder %s6351_s5, %s7682_s4 }
  0x6c   :  { %p6357_p6 = pnand %p6355_p5, %p6352_p4 }
  0x6e   :  { %6360 = shalt.err (!%p6357_p6)
}
  0x6f   :  { %s6361_s0 = scalar_lea.vmem %s66_s30, 512  ;;  %p6366_p8 = scmp.lt.s32.totalorder %s66_s30, %s66_s30 }
  0x70   :  { %p6362_p7 = scmp.ne.s32.totalorder %s66_s30, %s6361_s0  ;;  %p6367_p9 = scmp.lt.s32.totalorder %s6361_s0, %s6361_s0 }
  0x72   :  { %p6368_p10 = por %p6367_p9, %p6366_p8 }
  0x74   :  { %p6369_p11 = pnand %p6368_p10, %p6362_p7 }
  0x76   :  { %6372 = shalt.err (!%p6369_p11)
}
  0x77   :  { %71 = dma.hbm_to_vmem [thread:$0]  %s7682_s4, 512, %s66_s30, [#allocation5], %s6451_s2, %s6451_s2, %s6452_s27  }
  0x78   :  { %s6373_s1 = scalar_lea.hbm %s7649_s9, 256 }
  0x79   :  { %p6374_p12 = scmp.ne.s32.totalorder %s7649_s9, %s6373_s1  ;;  %p6377_p13 = scmp.lt.u32.totalorder %s6373_s1, %s7649_s9 }
  0x7b   :  { %p6379_p0 = pnand %p6377_p13, %p6374_p12 }
  0x7d   :  { %6382 = shalt.err (!%p6379_p0)
}
  0x7e   :  { %s6383_s24 = scalar_lea.vmem %s6651_s28, 256  ;;  %p6388_p2 = scmp.lt.s32.totalorder %s6651_s28, %s6651_s28 }
  0x7f   :  { %p6384_p1 = scmp.ne.s32.totalorder %s6651_s28, %s6383_s24  ;;  %p6389_p3 = scmp.lt.s32.totalorder %s6383_s24, %s6383_s24 }
  0x81   :  { %p6390_p4 = por %p6389_p3, %p6388_p2 }
  0x83   :  { %p6391_p5 = pnand %p6390_p4, %p6384_p1 }
  0x85   :  { %6394 = shalt.err (!%p6391_p5)
}
  0x86   :  { %101 = dma.hbm_to_vmem [thread:$0]  %s7649_s9, 256, %s6651_s28, [#allocation8], %s6451_s2, %s6451_s2, %s6452_s27  }
  0x87   :  { %s6457_s6 = smov [#allocation12]   ;;  %s6458_s0 = smov [#allocation13]  }
  0x88   :  { %s121_s25 = sshll.u32 %s6457_s6, 4  ;;  %s147_s21 = sshll.u32 %s6458_s0, 4  ;;  %s122_s25 = int_to_ptr.vmem [resolvable:$true] %s121_s25  ;;  %s6688_s21 = int_to_ptr.vmem [resolvable:$true] %s147_s21 }
  0x89   :  { %s6395_s26 = scalar_lea.hbm %s7652_s12, 3072 }
  0x8a   :  { %p6396_p6 = scmp.ne.s32.totalorder %s7652_s12, %s6395_s26  ;;  %p6399_p7 = scmp.lt.u32.totalorder %s6395_s26, %s7652_s12 }
  0x8c   :  { %p6401_p8 = pnand %p6399_p7, %p6396_p6 }
  0x8e   :  { %6404 = shalt.err (!%p6401_p8)
}
  0x8f   :  { %s6405_s9 = scalar_lea.vmem %s122_s25, 3072  ;;  %p6410_p10 = scmp.lt.s32.totalorder %s122_s25, %s122_s25 }
  0x90   :  { %p6406_p9 = scmp.ne.s32.totalorder %s122_s25, %s6405_s9  ;;  %p6411_p11 = scmp.lt.s32.totalorder %s6405_s9, %s6405_s9 }
  0x92   :  { %p6412_p12 = por %p6411_p11, %p6410_p10 }
  0x94   :  { %p6413_p13 = pnand %p6412_p12, %p6406_p9 }
  0x96   :  { %6416 = shalt.err (!%p6413_p13)
}
  0x97   :  { %127 = dma.hbm_to_vmem [thread:$0]  %s7652_s12, 3072, %s122_s25, [#allocation11], %s6451_s2, %s6451_s2, %s6452_s27  }
  0x98   :  { %s6417_s4 = scalar_lea.hbm %s7660_s20, 2048 }
  0x99   :  { %p6418_p0 = scmp.ne.s32.totalorder %s7660_s20, %s6417_s4  ;;  %p6421_p1 = scmp.lt.u32.totalorder %s6417_s4, %s7660_s20 }
  0x9b   :  { %p6423_p2 = pnand %p6421_p1, %p6418_p0 }
  0x9d   :  { %6426 = shalt.err (!%p6423_p2)
}
  0x9e   :  { %s6427_s26 = scalar_lea.vmem %s6688_s21, 2048  ;;  %p6432_p4 = scmp.lt.s32.totalorder %s6688_s21, %s6688_s21 }
  0x9f   :  { %p6428_p3 = scmp.ne.s32.totalorder %s6688_s21, %s6427_s26  ;;  %p6433_p5 = scmp.lt.s32.totalorder %s6427_s26, %s6427_s26 }
  0xa1   :  { %p6434_p6 = por %p6433_p5, %p6432_p4 }
  0xa3   :  { %p6435_p7 = pnand %p6434_p6, %p6428_p3 }
  0xa5   :  { %6438 = shalt.err (!%p6435_p7)
}
  0xa6   :  { %153 = dma.hbm_to_vmem [thread:$0]  %s7660_s20, 2048, %s6688_s21, [#allocation14], %s6451_s2, %s6451_s2, %s6452_s27  }
  0xa7   :  { %6439 = dma.done.wait [#allocation3], 1536  }
  0xa8   :  { %6440 = vsyncadd [#allocation3], 4294965760 }
  0xa9   :  { %6441 = dma.done.wait [#allocation5], 2048  }
  0xaa   :  { %6442 = vsyncadd [#allocation5], 4294965248 }
  0xab   :  { %6443 = dma.done.wait [#allocation8], 1024  }
  0xac   :  { %6444 = vsyncadd [#allocation8], 4294966272 }
  0xad   :  { %6445 = dma.done.wait [#allocation11], 3456  }
  0xae   :  { %6446 = vsyncadd [#allocation11], 4294963840 }
  0xaf   :  { %6447 = dma.done.wait [#allocation14], 2048  }
  0xb0   :  { %6448 = vsyncadd [#allocation14], 4294965248  ;;  %vm188_vm0 = vcmask 261120   ;;  %s7683_s3 = sld [smem:[#allocation20_spill]]  ;;  %v291_v5 = vld [vmem:[#allocation2 + $0x20] sm:$0xff]  ;;  %v394_v9 = vld [vmem:[#allocation4 + $0x28] sm:$0xff] }
  0xb1   :  { %4860 = vmatprep.mubr.msk.f32.mxu1 %vm188_vm0, %v291_v5  ;;  %v184_v7 = vld [vmem:[#allocation2] sm:$0xff]  ;;  %v292_v11 = vld [vmem:[#allocation2 + $0x28] sm:$0xff]  ;;  %v293_v13 = vld [vmem:[#allocation2 + $0x30] sm:$0xff]  ;;  %s7684_s24 = sld [smem:[#allocation25_spill]]  ;;  %s7685_s30 = sld [smem:[#allocation23_spill]]  ;;  %vm1168_vm1 = vcmask 130048  }
  0xb2   :  { %v393_v8 = vld [vmem:[#allocation4 + $0x20] sm:$0xff]  ;;  %4846 = vmatprep.mubr.msk.f32.mxu0 %vm188_vm0, %v184_v7  ;;  %v185_v12 = vld [vmem:[#allocation2 + $0x8] sm:$0xff]  ;;  %v186_v14 = vld [vmem:[#allocation2 + $0x10] sm:$0xff]  ;;  %vm1351_vm2 = vcmask 523264   ;;  %vm6460_vm3 = vmmov 0   ;;  %vm2025_vm4 = vcmask 64512  }
  0xb3   :  { %v5654_v10 = vpack.c.bf16 %v394_v9, %v393_v8  ;;  %v395_v15 = vld [vmem:[#allocation4 + $0x30] sm:$0xff]  ;;  %v396_v16 = vld [vmem:[#allocation4 + $0x38] sm:$0xff]  ;;  %v592_v19 = vld [vmem:[#allocation2 + $0x40] sm:$0xff]  ;;  %s7686_s2 = sld [smem:[#allocation27_spill]]  ;;  %s7687_s21 = sld [smem:[#allocation28_spill]] }
  0xb4   :  { %v294_v17 = vld [vmem:[#allocation2 + $0x38] sm:$0xff]  ;;  %v5658_v20 = vpack.c.bf16 %v396_v16, %v395_v15  ;;  %v593_v21 = vld [vmem:[#allocation2 + $0x48] sm:$0xff]  ;;  %v594_v22 = vld [vmem:[#allocation2 + $0x50] sm:$0xff] }
  0xb5   :  { %v187_v18 = vld [vmem:[#allocation2 + $0x18] sm:$0xff]  ;;  %v286_v24 = vld [vmem:[#allocation4] sm:$0xff]  ;;  %v287_v25 = vld [vmem:[#allocation4 + $0x8] sm:$0xff] }
  0xb6   :  { %v180_v0 = vld [vmem:[%s7683_s3] sm:$0xff]  ;;  %v181_v1 = vld [vmem:[%s7683_s3 + $0x8] sm:$0xff]  ;;  %v182_v2 = vld [vmem:[%s7683_s3 + $0x10] sm:$0xff]  ;;  %v5662_v26 = vpack.c.bf16 %v287_v25, %v286_v24 }
  0xb7   :  { %v5638_v3 = vpack.c.bf16 %v181_v1, %v180_v0  ;;  %v183_v4 = vld [vmem:[%s7683_s3 + $0x18] sm:$0xff]  ;;  %v288_v27 = vld [vmem:[#allocation4 + $0x10] sm:$0xff]  ;;  %v694_v34 = vld [vmem:[#allocation4 + $0x40] sm:$0xff] }
  0xb8   :  { %v5642_v6 = vpack.c.bf16 %v183_v4, %v182_v2  ;;  %v595_v23 = vld [vmem:[#allocation2 + $0x58] sm:$0xff]  ;;  %v695_v35 = vld [vmem:[#allocation4 + $0x48] sm:$0xff]  ;;  %v696_v41 = vld [vmem:[#allocation4 + $0x50] sm:$0xff] }
  0xb9   :  { %5647 = vmatprep.subr.bf16.mxu1 %v5638_v3  ;;  %5639 = vmatprep.subr.bf16.mxu0 %v5638_v3  ;;  %v289_v28 = vld [vmem:[#allocation4 + $0x18] sm:$0xff]  ;;  %v5678_v39 = vpack.c.bf16 %v695_v35, %v694_v34  ;;  %v810_v48 = vld [vmem:[#allocation6] sm:$0xff]  ;;  %v980_v50 = vld [vmem:[%s7684_s24 + $0x8] sm:$0xff] }
  0xba   :  { %5649 = vmatpush3.bf16.msra.mxu1 %v5638_v3  ;;  %5641 = vmatpush3.bf16.msra.mxu0 %v5638_v3  ;;  %v5666_v32 = vpack.c.bf16 %v289_v28, %v288_v27  ;;  %v697_v42 = vld [vmem:[#allocation4 + $0x58] sm:$0xff]  ;;  %v979_v49 = vld [vmem:[%s7684_s24] sm:$0xff]  ;;  %v981_v52 = vld [vmem:[%s7684_s24 + $0x10] sm:$0xff] }
  0xbb   :  { %5651 = vmatprep.subr.bf16.mxu1 %v5642_v6  ;;  %5643 = vmatprep.subr.bf16.mxu0 %v5642_v6  ;;  %v5682_v44 = vpack.c.bf16 %v697_v42, %v696_v41  ;;  %v5702_v51 = vpack.c.bf16 %v980_v50, %v979_v49  ;;  %v982_v53 = vld [vmem:[%s7684_s24 + $0x18] sm:$0xff]  ;;  %v983_v55 = vld [vmem:[%s7684_s24 + $0x20] sm:$0xff]  ;;  %v984_v56 = vld [vmem:[%s7684_s24 + $0x28] sm:$0xff] }
  0xbc   :  { %v5706_v54 = vpack.c.bf16 %v982_v53, %v981_v52  ;;  %v5710_v57 = vpack.c.bf16 %v984_v56, %v983_v55  ;;  %v985_v58 = vld [vmem:[%s7684_s24 + $0x30] sm:$0xff]  ;;  %v986_v59 = vld [vmem:[%s7684_s24 + $0x38] sm:$0xff]  ;;  %v987_v61 = vld [vmem:[%s7684_s24 + $0x40] sm:$0xff] }
  0xbd   :  { %v5714_v60 = vpack.c.bf16 %v986_v59, %v985_v58  ;;  %v988_v62 = vld [vmem:[%s7684_s24 + $0x48] sm:$0xff]  ;;  %v4203_v0 = vld [vmem:[%s7685_s30] ss:$0 sm:$0xff]  ;;  %v4210_v16 = vld [vmem:[%s7684_s24 + $0x90] sm:$0xff] }
  0xbe   :  { %5653 = vmatpush3.bf16.msra.mxu1 %v5642_v6  ;;  %5645 = vmatpush3.bf16.msra.mxu0 %v5642_v6  ;;  %v5718_v63 = vpack.c.bf16 %v988_v62, %v987_v61  ;;  %v4215_v24 = vld [vmem:[%s7684_s24 + $0xb8] sm:$0xff]  ;;  %v4217_v27 = vld [vmem:[%s7684_s24 + $0xc8] sm:$0xff]  ;;  %v991_v35 = vld [vmem:[%s7684_s24 + $0x60] sm:$0xff] }
  0xbf   :  { %5671 = vmatprep.subr.bf16.mxu1 %v5638_v3  ;;  %5655 = vmatprep.subr.bf16.mxu0 %v5654_v10  ;;  %v993_v41 = vld [vmem:[%s7684_s24 + $0x70] sm:$0xff]  ;;  %v994_v42 = vld [vmem:[%s7684_s24 + $0x78] sm:$0xff]  ;;  %v1166_v53 = vld [vmem:[#allocation7] sm:$0xff] }
  0xc0   :  { %v4229_v55 = vld [vmem:[%s7647_s7 + $0x48] sm:$0xff]  ;;  %v4230_v56 = vld [vmem:[%s7647_s7 + $0x50] sm:$0xff]  ;;  %v4231_v58 = vld [vmem:[%s7647_s7 + $0x58] sm:$0xff] }
  0xc1   :  { %4861 = vmatmul.mubr.msk.f32.vlgmr.msra.gmra.mrb[0].mxu1 %vm188_vm0, %v292_v11  ;;  %4847 = vmatmul.mubr.msk.f32.vlgmr.msra.gmra.mrb[0].mxu0 %vm188_vm0, %v185_v12  ;;  %v811_v11 = vld [vmem:[#allocation6 + $0x8] sm:$0xff]  ;;  %v894_v12 = vld [vmem:[#allocation6 + $0x10] sm:$0xff]  ;;  %v5778_v59 = vpack.c.bf16 %v4231_v58, %v4230_v56 }
  0xc2   :  { %4863 = vmatprep.mubr.msk.f32.mxu1 %vm188_vm0, %v293_v13  ;;  %5673 = vmatpush3.bf16.msra.mxu1 %v5638_v3  ;;  %v4208_v13 = vld [vmem:[%s7684_s24 + $0x80] sm:$0xff]  ;;  %v4233_v61 = vld [vmem:[%s7647_s7 + $0x68] sm:$0xff] }
  0xc3   :  { %4849 = vmatprep.mubr.msk.f32.mxu0 %vm188_vm0, %v186_v14  ;;  %5675 = vmatprep.subr.bf16.mxu1 %v5642_v6  ;;  %v4209_v14 = vld [vmem:[%s7684_s24 + $0x88] sm:$0xff] }
  0xc4   :  { %5657 = vmatpush3.bf16.msra.mxu0 %v5654_v10  ;;  %v5734_v15 = vpack.c.bf16 %v4209_v14, %v4208_v13  ;;  %v4234_v13 = vld [vmem:[%s7647_s7 + $0x70] sm:$0xff]  ;;  %v4235_v14 = vld [vmem:[%s7647_s7 + $0x78] sm:$0xff]  ;;  %v1850_v56 = vld [vmem:[%s7650_s10 + $0x8] sm:$0xff] }
  0xc5   :  { %4864 = vmatmul.mubr.msk.f32.gmra.mrb[2].mxu1 %vm188_vm0, %v294_v17  ;;  %4850 = vmatmul.mubr.msk.f32.gmra.mrb[2].mxu0 %vm188_vm0, %v187_v18  ;;  %v4211_v17 = vld [vmem:[%s7684_s24 + $0x98] sm:$0xff] }
  0xc6   :  { %5677 = vmatpush3.bf16.msra.mxu1 %v5642_v6  ;;  %4902 = vmatprep.mubr.msk.f32.mxu1 %vm188_vm0, %v592_v19  ;;  %v895_v18 = vld [vmem:[#allocation6 + $0x18] sm:$0xff]  ;;  %v5738_v19 = vpack.c.bf16 %v4211_v17, %v4210_v16  ;;  %v1250_v16 = vld [vmem:[%s7647_s7] sm:$0xff]  ;;  %v1251_v17 = vld [vmem:[%s7647_s7 + $0x8] sm:$0xff] }
  0xc7   :  { %5659 = vmatprep.subr.bf16.mxu0 %v5658_v20 }
  0xc8   :  { %5661 = vmatpush3.bf16.msra.mxu0 %v5658_v20  ;;  %v4212_v20 = vld [vmem:[%s7684_s24 + $0xa0] sm:$0xff] }
  0xc9   :  { %4903 = vmatmul.mubr.msk.f32.vlgmr.msra.gmra.mrb[4].mxu1 %vm188_vm0, %v593_v21  ;;  %5663 = vmatprep.subr.bf16.mxu0 %v5662_v26  ;;  %v4213_v21 = vld [vmem:[%s7684_s24 + $0xa8] sm:$0xff] }
  0xca   :  { %4905 = vmatprep.mubr.msk.f32.mxu1 %vm188_vm0, %v594_v22  ;;  %v5742_v22 = vpack.c.bf16 %v4213_v21, %v4212_v20  ;;  %v1252_v21 = vld [vmem:[%s7647_s7 + $0x10] sm:$0xff] }
  0xcd   :  { %4906 = vmatmul.mubr.msk.f32.gmra.mrb[6].mxu1 %vm188_vm0, %v595_v23  ;;  %v4214_v23 = vld [vmem:[%s7684_s24 + $0xb0] sm:$0xff] }
  0xce   :  { %4930 = vmatprep.mubr.msk.f32.mxu1 %vm188_vm0, %v810_v48  ;;  %v5746_v25 = vpack.c.bf16 %v4215_v24, %v4214_v23 }
 0x194   :  { %v4862_v29 = vpop.f32.mrb[0].mxu1  ;;  %v4848_v30 = vpop.f32.mrb[0].mxu0 }
 0x195   :  { %v373_v31 = vpop.f32.mrb[1].mxu1  ;;  %v267_v33 = vpop.f32.mrb[1].mxu0 }
 0x196   :  { %4874 = vmatprep.mubr.msk.f32.mxu0 %vm188_vm0, %v373_v31  ;;  %v4218_v31 = vld [vmem:[%s7684_s24 + $0xd0] sm:$0xff] }
 0x197   :  { %4875 = vmatmul.mubr.msk.f32.vlgmr.msra.gmra.mrb[4].mxu0 %vm188_vm0, %v4862_v29  ;;  %v989_v29 = vld [vmem:[%s7684_s24 + $0x50] sm:$0xff] }
 0x198   :  { %v4865_v36 = vpop.f32.mrb[2].mxu1  ;;  %5665 = vmatpush3.bf16.msra.mxu0 %v5662_v26  ;;  %v4851_v37 = vpop.f32.mrb[2].mxu0  ;;  %v4216_v26 = vld [vmem:[%s7684_s24 + $0xc0] sm:$0xff] }
 0x199   :  { %v383_v38 = vpop.f32.mrb[3].mxu1  ;;  %5667 = vmatprep.subr.bf16.mxu0 %v5666_v32  ;;  %v277_v40 = vpop.f32.mrb[3].mxu0  ;;  %v5750_v28 = vpack.c.bf16 %v4217_v27, %v4216_v26  ;;  %v1254_v26 = vld [vmem:[%s7647_s7 + $0x20] sm:$0xff]  ;;  %v1255_v27 = vld [vmem:[%s7647_s7 + $0x28] sm:$0xff] }
 0x19a   :  { %4877 = vmatprep.mubr.msk.f32.mxu0 %vm188_vm0, %v383_v38 }
 0x19b   :  { %4878 = vmatmul.mubr.msk.f32.gmra.mrb[6].mxu0 %vm188_vm0, %v4865_v36  ;;  %v992_v36 = vld [vmem:[%s7684_s24 + $0x68] sm:$0xff] }
 0x19c   :  { %5669 = vmatpush3.bf16.msra.mxu0 %v5666_v32  ;;  %4888 = vmatprep.mubr.msk.f32.mxu0 %vm188_vm0, %v267_v33  ;;  %v4904_v43 = vpop.f32.mrb[4].mxu1  ;;  %v4219_v33 = vld [vmem:[%s7684_s24 + $0xd8] sm:$0xff]  ;;  %v5726_v38 = vpack.c.bf16 %v992_v36, %v991_v35  ;;  %v4243_v35 = vld [vmem:[%s7647_s7 + $0x88] sm:$0xff] }
 0x19d   :  { %5679 = vmatprep.subr.bf16.mxu0 %v5678_v39  ;;  %v674_v45 = vpop.f32.mrb[5].mxu1  ;;  %v5754_v34 = vpack.c.bf16 %v4219_v33, %v4218_v31  ;;  %v1256_v31 = vld [vmem:[%s7647_s7 + $0x30] sm:$0xff] }
 0x19f   :  { %4889 = vmatmul.mubr.msk.f32.vlgmr.msra.gmra.mrb[4].mxu0 %vm188_vm0, %v4848_v30  ;;  %v990_v30 = vld [vmem:[%s7684_s24 + $0x58] sm:$0xff] }
 0x1a0   :  { %5681 = vmatpush3.bf16.msra.mxu0 %v5678_v39  ;;  %4891 = vmatprep.mubr.msk.f32.mxu0 %vm188_vm0, %v277_v40  ;;  %v4907_v46 = vpop.f32.mrb[6].mxu1  ;;  %v5722_v32 = vpack.c.bf16 %v990_v30, %v989_v29  ;;  %v4221_v39 = vld [vmem:[%s7684_s24 + $0xe8] sm:$0xff]  ;;  %v5798_v29 = vpack.c.bf16 %v1255_v27, %v1254_v26  ;;  %v4259_v27 = vld [vmem:[%s7650_s10 + $0xa0] sm:$0xff] }
 0x1a1   :  { %5683 = vmatprep.subr.bf16.mxu0 %v5682_v44  ;;  %v684_v47 = vpop.f32.mrb[7].mxu1 }
 0x1a3   :  { %4892 = vmatmul.mubr.msk.f32.gmra.mrb[6].mxu0 %vm188_vm0, %v4851_v37  ;;  %v4220_v37 = vld [vmem:[%s7684_s24 + $0xe0] sm:$0xff] }
 0x1a4   :  { %5685 = vmatpush3.bf16.msra.mxu0 %v5682_v44  ;;  %4916 = vmatprep.mubr.msk.f32.mxu0 %vm188_vm0, %v674_v45  ;;  %v5758_v40 = vpack.c.bf16 %v4221_v39, %v4220_v37  ;;  %v5730_v44 = vpack.c.bf16 %v994_v42, %v993_v41  ;;  %v4223_v45 = vld [vmem:[%s7684_s24 + $0xf8] sm:$0xff]  ;;  %v4244_v37 = vld [vmem:[%s7647_s7 + $0x90] sm:$0xff]  ;;  %v4247_v41 = vld [vmem:[%s7647_s7 + $0xa8] sm:$0xff] }
 0x1a5   :  { %5703 = vmatprep.subr.bf16.mxu0 %v5702_v51 }
 0x1a7   :  { %4917 = vmatmul.mubr.msk.f32.vlgmr.msra.gmra.mrb[4].mxu0 %vm188_vm0, %v4904_v43  ;;  %v4222_v43 = vld [vmem:[%s7684_s24 + $0xf0] sm:$0xff] }
 0x1a8   :  { %4919 = vmatprep.mubr.msk.f32.mxu0 %vm188_vm0, %v684_v47  ;;  %5705 = vmatpush3.bf16.msra.mxu0 %v5702_v51 }
 0x1a9   :  { %5707 = vmatprep.subr.bf16.mxu0 %v5706_v54 }
 0x1ab   :  { %4920 = vmatmul.mubr.msk.f32.gmra.mrb[6].mxu0 %vm188_vm0, %v4907_v46  ;;  %v5762_v46 = vpack.c.bf16 %v4223_v45, %v4222_v43  ;;  %v4248_v43 = vld [vmem:[%s7647_s7 + $0xb0] sm:$0xff] }
 0x1ac   :  { %5709 = vmatpush3.bf16.msra.mxu0 %v5706_v54  ;;  %v4228_v54 = vld [vmem:[%s7647_s7 + $0x40] sm:$0xff] }
 0x1ad   :  { %5711 = vmatprep.subr.bf16.mxu0 %v5710_v57 }
 0x1b0   :  { %5713 = vmatpush3.bf16.msra.mxu0 %v5710_v57  ;;  %v5774_v57 = vpack.c.bf16 %v4229_v55, %v4228_v54  ;;  %v1699_v54 = vld [vmem:[#allocation9] sm:$0xff]  ;;  %v1849_v55 = vld [vmem:[%s7650_s10] sm:$0xff] }
 0x1b1   :  { %5715 = vmatprep.subr.bf16.mxu0 %v5714_v60  ;;  %v5833_v58 = vpack.c.bf16 %v1850_v56, %v1849_v55  ;;  %v2184_v55 = vld [vmem:[#allocation12 + $0x48] sm:$0xff]  ;;  %v2338_v56 = vld [vmem:[#allocation10 + $0x10] sm:$0xff] }
 0x1b4   :  { %5717 = vmatpush3.bf16.msra.mxu0 %v5714_v60  ;;  %v4232_v60 = vld [vmem:[%s7647_s7 + $0x60] sm:$0xff] }
 0x1b5   :  { %5719 = vmatprep.subr.bf16.mxu0 %v5718_v63  ;;  %v5782_v62 = vpack.c.bf16 %v4233_v61, %v4232_v60  ;;  %v1852_v60 = vld [vmem:[%s7650_s10 + $0x18] sm:$0xff] }
 0x1b8   :  { %5721 = vmatpush3.bf16.msra.mxu0 %v5718_v63 }
 0x1b9   :  { %5723 = vmatprep.subr.bf16.mxu0 %v5722_v32 }
 0x1bc   :  { %5725 = vmatpush3.bf16.msra.mxu0 %v5722_v32  ;;  %v1257_v32 = vld [vmem:[%s7647_s7 + $0x38] sm:$0xff] }
 0x1bd   :  { %5727 = vmatprep.subr.bf16.mxu0 %v5726_v38  ;;  %v5802_v33 = vpack.c.bf16 %v1257_v32, %v1256_v31  ;;  %v4262_v31 = vld [vmem:[%s7650_s10 + $0xb8] sm:$0xff] }
 0x1c0   :  { %5729 = vmatpush3.bf16.msra.mxu0 %v5726_v38  ;;  %v4245_v38 = vld [vmem:[%s7647_s7 + $0x98] sm:$0xff] }
 0x1c1   :  { %5731 = vmatprep.subr.bf16.mxu0 %v5730_v44  ;;  %v5814_v39 = vpack.c.bf16 %v4245_v38, %v4244_v37  ;;  %v4266_v37 = vld [vmem:[%s7650_s10 + $0xd8] sm:$0xff] }
 0x1c4   :  { %5733 = vmatpush3.bf16.msra.mxu0 %v5730_v44  ;;  %v4249_v44 = vld [vmem:[%s7647_s7 + $0xb8] sm:$0xff] }
 0x1c5   :  { %5775 = vmatprep.subr.bf16.mxu0 %v5774_v57  ;;  %v5822_v45 = vpack.c.bf16 %v4249_v44, %v4248_v43  ;;  %v4270_v43 = vld [vmem:[%s7650_s10 + $0xf8] sm:$0xff] }
 0x27a   :  { %v4918_v1 = vpop.f32.mrb[4].mxu0 }
 0x27b   :  { %v807_v2 = vadd.f32 %v4918_v1, %v4203_v0  ;;  %v776_v3 = vpop.f32.mrb[5].mxu0 }
 0x27c   :  { %v806_v4 = vadd.f32 %v4203_v0, %v776_v3 }
 0x27e   :  { %v5686_v5 = vpack.c.bf16 %v807_v2, %v806_v4  ;;  %v4921_v6 = vpop.f32.mrb[6].mxu0 }
 0x27f   :  { %v809_v7 = vadd.f32 %v4921_v6, %v4203_v0  ;;  %v786_v8 = vpop.f32.mrb[7].mxu0 }
 0x280   :  { %v808_v9 = vadd.f32 %v4203_v0, %v786_v8  ;;  %5687 = vmatprep.subr.bf16.mxu1 %v5686_v5  ;;  %v1167_v8 = vld [vmem:[#allocation7 + $0x8] sm:$0xff] }
 0x281   :  { %5689 = vmatpush3.bf16.msra.mxu1 %v5686_v5 }
 0x282   :  { %v5690_v10 = vpack.c.bf16 %v809_v7, %v808_v9  ;;  %v1259_v9 = vld [vmem:[#allocation7 + $0x10] sm:$0xff] }
 0x284   :  { %5691 = vmatprep.subr.bf16.mxu1 %v5690_v10 }
 0x285   :  { %5693 = vmatpush3.bf16.msra.mxu1 %v5690_v10 }
 0x286   :  { %5695 = vmatprep.subr.bf16.mxu1 %v5686_v5 }
 0x288   :  { %4931 = vmatmul.mubr.msk.f32.vlgmr.msra.gmra.mrb[8].mxu1 %vm188_vm0, %v811_v11  ;;  %v1515_v11 = vld [vmem:[#allocation7 + $0x20] sm:$0xff] }
 0x289   :  { %5697 = vmatpush3.bf16.msra.mxu1 %v5686_v5  ;;  %4941 = vmatprep.mubr.msk.f32.mxu1 %vm188_vm0, %v894_v12  ;;  %v1516_v12 = vld [vmem:[#allocation7 + $0x28] sm:$0xff] }
 0x28a   :  { %5699 = vmatprep.subr.bf16.mxu1 %v5690_v10 }
 0x28d   :  { %5701 = vmatpush3.bf16.msra.mxu1 %v5690_v10  ;;  %v1260_v10 = vld [vmem:[#allocation7 + $0x18] sm:$0xff] }
 0x28e   :  { %5735 = vmatprep.subr.bf16.mxu1 %v5734_v15 }
 0x290   :  { %4942 = vmatmul.mubr.msk.f32.vlgmr.msra.gmra.mrb[10].mxu1 %vm188_vm0, %v895_v18  ;;  %v5790_v18 = vpack.c.bf16 %v1251_v17, %v1250_v16 }
 0x291   :  { %5737 = vmatpush3.bf16.msra.mxu1 %v5734_v15  ;;  %v5786_v15 = vpack.c.bf16 %v4235_v14, %v4234_v13  ;;  %v1863_v13 = vld [vmem:[%s7650_s10 + $0x70] sm:$0xff]  ;;  %v1864_v14 = vld [vmem:[%s7650_s10 + $0x78] sm:$0xff] }
 0x292   :  { %5739 = vmatprep.subr.bf16.mxu1 %v5738_v19 }
 0x295   :  { %5741 = vmatpush3.bf16.msra.mxu1 %v5738_v19 }
 0x296   :  { %5743 = vmatprep.subr.bf16.mxu1 %v5742_v22 }
 0x299   :  { %5745 = vmatpush3.bf16.msra.mxu1 %v5742_v22  ;;  %v1253_v22 = vld [vmem:[%s7647_s7 + $0x18] sm:$0xff] }
 0x29a   :  { %5747 = vmatprep.subr.bf16.mxu1 %v5746_v25 }
 0x29d   :  { %5749 = vmatpush3.bf16.msra.mxu1 %v5746_v25  ;;  %v5794_v25 = vpack.c.bf16 %v1253_v22, %v1252_v21 }
 0x29e   :  { %5751 = vmatprep.subr.bf16.mxu1 %v5750_v28 }
 0x2a1   :  { %5753 = vmatpush3.bf16.msra.mxu1 %v5750_v28 }
 0x2a2   :  { %5755 = vmatprep.subr.bf16.mxu1 %v5754_v34 }
 0x2a5   :  { %5757 = vmatpush3.bf16.msra.mxu1 %v5754_v34  ;;  %v4242_v34 = vld [vmem:[%s7647_s7 + $0x80] sm:$0xff] }
 0x2a6   :  { %5759 = vmatprep.subr.bf16.mxu1 %v5758_v40  ;;  %v5810_v36 = vpack.c.bf16 %v4243_v35, %v4242_v34  ;;  %v4264_v34 = vld [vmem:[%s7650_s10 + $0xc8] sm:$0xff] }
 0x2a9   :  { %5761 = vmatpush3.bf16.msra.mxu1 %v5758_v40  ;;  %v4246_v40 = vld [vmem:[%s7647_s7 + $0xa0] sm:$0xff] }
 0x2aa   :  { %5763 = vmatprep.subr.bf16.mxu1 %v5762_v46  ;;  %v5818_v42 = vpack.c.bf16 %v4247_v41, %v4246_v40  ;;  %v4268_v40 = vld [vmem:[%s7650_s10 + $0xe8] sm:$0xff] }
 0x2ad   :  { %5765 = vmatpush3.bf16.msra.mxu1 %v5762_v46  ;;  %v6459_v46 = vmov 0.0|0.0  }
 0x35b   :  { %v4932_v47 = vpop.f32.mrb[8].mxu1 }
 0x35c   :  { %v884_v48 = vpop.f32.mrb[9].mxu1 }
 0x363   :  { %v4943_v49 = vpop.f32.mrb[10].mxu1 }
 0x364   :  { %v978_v50 = vmax.f32 %v4932_v47, %v4943_v49  ;;  %v968_v51 = vpop.f32.mrb[11].mxu1  ;;  %v6461_v47 = vmov 0.0  }
 0x365   :  { %v977_v52 = vmax.f32 %v884_v48, %v968_v51  ;;  %v4252_v48 = vld [vmem:[%s7648_s8] ss:$0 sm:$0xff] }
 0x367   :  { %4976 = vmatprep.mubr.f32.mxu0 %v977_v52  ;;  %5011 = vmatprep.mubr.f32.mxu1 %v977_v52 }
 0x368   :  { %4977 = vmatmul.mubr.f32.vlgmr.msra.gmra.mrb[8].mxu0 %v978_v50  ;;  %5012 = vmatmul.mubr.f32.vlgmr.msra.gmra.mrb[12].mxu1 %v978_v50 }
 0x369   :  { %5018 = vmatprep.mubr.msk.f32.mxu1 %vm1168_vm1, %v1166_v53  ;;  %5777 = vmatpush3.bf16.msra.mxu0 %v5774_v57  ;;  %v1774_v57 = vld [vmem:[#allocation9 + $0x8] sm:$0xff] }
 0x36a   :  { %5779 = vmatprep.subr.bf16.mxu0 %v5778_v59 }
 0x36d   :  { %5781 = vmatpush3.bf16.msra.mxu0 %v5778_v59  ;;  %v1851_v59 = vld [vmem:[%s7650_s10 + $0x10] sm:$0xff] }
 0x36e   :  { %5783 = vmatprep.subr.bf16.mxu0 %v5782_v62  ;;  %v5836_v61 = vpack.c.bf16 %v1852_v60, %v1851_v59  ;;  %v2185_v59 = vld [vmem:[#allocation12 + $0x50] sm:$0xff]  ;;  %v2186_v60 = vld [vmem:[#allocation12 + $0x58] sm:$0xff] }
 0x371   :  { %5785 = vmatpush3.bf16.msra.mxu0 %v5782_v62  ;;  %v1853_v62 = vld [vmem:[%s7650_s10 + $0x20] sm:$0xff] }
 0x372   :  { %5787 = vmatprep.subr.bf16.mxu0 %v5786_v15 }
 0x375   :  { %5789 = vmatpush3.bf16.msra.mxu0 %v5786_v15  ;;  %v5854_v15 = vpack.c.bf16 %v1864_v14, %v1863_v13  ;;  %v2419_v13 = vld [vmem:[#allocation12 + $0xb0] sm:$0xff]  ;;  %v2420_v14 = vld [vmem:[#allocation12 + $0xb8] sm:$0xff] }
 0x376   :  { %5791 = vmatprep.subr.bf16.mxu0 %v5790_v18 }
 0x43b   :  { %v4978_v63 = vpop.f32.mrb[8].mxu0  ;;  %v5013_v0 = vpop.f32.mrb[12].mxu1 }
 0x43c   :  { %v1163_v1 = vmax.f32 %v4978_v63, %v5013_v0  ;;  %v1061_v2 = vpop.f32.mrb[9].mxu0  ;;  %v1153_v3 = vpop.f32.mrb[13].mxu1  ;;  %v1854_v63 = vld [vmem:[%s7650_s10 + $0x28] sm:$0xff] }
 0x43d   :  { %v1162_v4 = vmax.f32 %v1061_v2, %v1153_v3  ;;  %v5839_v0 = vpack.c.bf16 %v1854_v63, %v1853_v62  ;;  %v1856_v2 = vld [vmem:[%s7650_s10 + $0x38] sm:$0xff]  ;;  %v2188_v63 = vld [vmem:[#allocation12 + $0x68] sm:$0xff] }
 0x43e   :  { %v1165_v5 = vmax.f32 %v1163_v1, 0.0  ;;  %v1855_v1 = vld [vmem:[%s7650_s10 + $0x30] sm:$0xff]  ;;  %v2187_v62 = vld [vmem:[#allocation12 + $0x60] sm:$0xff] }
 0x43f   :  { %v1164_v6 = vmax.f32 %v1162_v4, 0.0  ;;  %v5842_v3 = vpack.c.bf16 %v1856_v2, %v1855_v1  ;;  %v1857_v4 = vld [vmem:[%s7650_s10 + $0x40] sm:$0xff]  ;;  %v2189_v1 = vld [vmem:[#allocation12 + $0x70] sm:$0xff]  ;;  %v2190_v2 = vld [vmem:[#allocation12 + $0x78] sm:$0xff] }
 0x441   :  { %v5766_v7 = vpack.c.bf16 %v1165_v5, %v1164_v6  ;;  %v1858_v5 = vld [vmem:[%s7650_s10 + $0x48] sm:$0xff] }
 0x442   :  { %v5845_v6 = vpack.c.bf16 %v1858_v5, %v1857_v4  ;;  %v2413_v4 = vld [vmem:[#allocation12 + $0x80] sm:$0xff]  ;;  %v2414_v5 = vld [vmem:[#allocation12 + $0x88] sm:$0xff] }
 0x443   :  { %5767 = vmatprep.subr.bf16.mxu1 %v5766_v7 }
 0x444   :  { %5769 = vmatpush3.bf16.msra.mxu1 %v5766_v7 }
 0x445   :  { %5771 = vmatprep.subr.bf16.mxu1 %v5766_v7 }
 0x447   :  { %5019 = vmatmul.mubr.msk.f32.vlgmr.msra.gmra.mrb[14].mxu1 %vm1168_vm1, %v1167_v8  ;;  %v1860_v8 = vld [vmem:[%s7650_s10 + $0x58] sm:$0xff] }
 0x448   :  { %5773 = vmatpush3.bf16.msra.mxu1 %v5766_v7  ;;  %5025 = vmatprep.mubr.msk.f32.mxu1 %vm1168_vm1, %v1259_v9 }
 0x449   :  { %5807 = vmatprep.subr.bf16.mxu1 %v5766_v7 }
 0x44b   :  { %5026 = vmatmul.mubr.msk.f32.vlgmr.msra.gmra.mrb[16].mxu1 %vm1168_vm1, %v1260_v10  ;;  %v1861_v10 = vld [vmem:[%s7650_s10 + $0x60] sm:$0xff] }
 0x44c   :  { %5809 = vmatpush3.bf16.msra.mxu1 %v5766_v7  ;;  %5070 = vmatprep.mubr.msk.f32.mxu1 %vm1168_vm1, %v1515_v11  ;;  %v1859_v7 = vld [vmem:[%s7650_s10 + $0x50] sm:$0xff]  ;;  %v1862_v11 = vld [vmem:[%s7650_s10 + $0x68] sm:$0xff] }
 0x44d   :  { %5826 = vmatprep.subr.bf16.mxu1 %v6459_v46  ;;  %v5848_v9 = vpack.c.bf16 %v1860_v8, %v1859_v7  ;;  %v2415_v7 = vld [vmem:[#allocation12 + $0x90] sm:$0xff]  ;;  %v2416_v8 = vld [vmem:[#allocation12 + $0x98] sm:$0xff] }
 0x44f   :  { %5071 = vmatmul.mubr.msk.f32.vlgmr.msra.gmra.mrb[18].mxu1 %vm1168_vm1, %v1516_v12  ;;  %v5851_v12 = vpack.c.bf16 %v1862_v11, %v1861_v10  ;;  %v2417_v10 = vld [vmem:[#allocation12 + $0xa0] sm:$0xff]  ;;  %v2418_v11 = vld [vmem:[#allocation12 + $0xa8] sm:$0xff] }
 0x450   :  { %5096 = vmatprep.mubr.msk.f32.mxu1 %vm6460_vm3, %v6461_v47 }
 0x51a   :  { %v5020_v19 = vpop.f32.mrb[14].mxu1 }
 0x51b   :  { %v1241_v20 = vpop.f32.mrb[15].mxu1 }
 0x51e   :  { %v5027_v23 = vpop.f32.mrb[16].mxu1 }
 0x51f   :  { %v1333_v24 = vpop.f32.mrb[17].mxu1 }
 0x520   :  { %5044 = vmatprep.mubr.msk.f32.mxu0 %vm1351_vm2, %v1333_v24  ;;  %v4257_v24 = vld [vmem:[%s7650_s10 + $0x90] sm:$0xff] }
 0x521   :  { %5045 = vmatmul.mubr.msk.f32.vlgmr.msra.gmra.mrb[10].mxu0 %vm1351_vm2, %v5027_v23 }
 0x522   :  { %5793 = vmatpush3.bf16.msra.mxu0 %v5790_v18  ;;  %5063 = vmatprep.mubr.msk.f32.mxu0 %vm1351_vm2, %v1241_v20  ;;  %v5072_v28 = vpop.f32.mrb[18].mxu1  ;;  %v4255_v18 = vld [vmem:[%s7650_s10 + $0x80] sm:$0xff] }
 0x523   :  { %5795 = vmatprep.subr.bf16.mxu0 %v5794_v25  ;;  %v1589_v30 = vpop.f32.mrb[19].mxu1 }
 0x526   :  { %5797 = vmatpush3.bf16.msra.mxu0 %v5794_v25  ;;  %v4258_v25 = vld [vmem:[%s7650_s10 + $0x98] sm:$0xff] }
 0x527   :  { %5799 = vmatprep.subr.bf16.mxu0 %v5798_v29  ;;  %v5860_v26 = vpack.c.bf16 %v4258_v25, %v4257_v24 }
 0x52a   :  { %5801 = vmatpush3.bf16.msra.mxu0 %v5798_v29 }
 0x52b   :  { %5803 = vmatprep.subr.bf16.mxu0 %v5802_v33 }
 0x52e   :  { %5805 = vmatpush3.bf16.msra.mxu0 %v5802_v33  ;;  %v4263_v33 = vld [vmem:[%s7650_s10 + $0xc0] sm:$0xff] }
 0x52f   :  { %5811 = vmatprep.subr.bf16.mxu0 %v5810_v36  ;;  %v5869_v35 = vpack.c.bf16 %v4264_v34, %v4263_v33  ;;  %v4300_v34 = vld [vmem:[%s7654_s14 + $0x20] sm:$0xff] }
 0x531   :  { %5064 = vmatmul.mubr.msk.f32.vlgmr.msra.gmra.mrb[10].mxu0 %vm1351_vm2, %v5020_v19  ;;  %v4256_v19 = vld [vmem:[%s7650_s10 + $0x88] sm:$0xff] }
 0x532   :  { %5813 = vmatpush3.bf16.msra.mxu0 %v5810_v36  ;;  %5089 = vmatprep.mubr.msk.f32.mxu0 %vm1351_vm2, %v1589_v30  ;;  %v5857_v21 = vpack.c.bf16 %v4256_v19, %v4255_v18  ;;  %v4261_v30 = vld [vmem:[%s7650_s10 + $0xb0] sm:$0xff] }
 0x533   :  { %5815 = vmatprep.subr.bf16.mxu0 %v5814_v39  ;;  %v5866_v32 = vpack.c.bf16 %v4262_v31, %v4261_v30  ;;  %v4265_v36 = vld [vmem:[%s7650_s10 + $0xd0] sm:$0xff]  ;;  %v2105_v31 = vld [vmem:[#allocation12 + $0x30] sm:$0xff] }
 0x534   :  { %v5872_v38 = vpack.c.bf16 %v4266_v37, %v4265_v36 }
 0x536   :  { %5817 = vmatpush3.bf16.msra.mxu0 %v5814_v39  ;;  %v4267_v39 = vld [vmem:[%s7650_s10 + $0xe0] sm:$0xff] }
 0x537   :  { %5819 = vmatprep.subr.bf16.mxu0 %v5818_v42  ;;  %v5875_v41 = vpack.c.bf16 %v4268_v40, %v4267_v39 }
 0x53a   :  { %5821 = vmatpush3.bf16.msra.mxu0 %v5818_v42  ;;  %v4269_v42 = vld [vmem:[%s7650_s10 + $0xf0] sm:$0xff] }
 0x53b   :  { %5823 = vmatprep.subr.bf16.mxu0 %v5822_v45  ;;  %v5878_v44 = vpack.c.bf16 %v4270_v43, %v4269_v42 }
 0x53e   :  { %5825 = vmatpush3.bf16.msra.mxu0 %v5822_v45 }
 0x53f   :  { %5176 = vmatprep.subr.mxu0 %v6461_v47 }
 0x541   :  { %5090 = vmatmul.mubr.msk.f32.vlgmr.msra.gmra.mrb[10].mxu0 %vm1351_vm2, %v5072_v28  ;;  %v4260_v28 = vld [vmem:[%s7650_s10 + $0xa8] sm:$0xff] }
 0x542   :  { %5178 = vmatprep.mubr.msk.f32.mxu0 %vm6460_vm3, %v6461_v47  ;;  %v5863_v29 = vpack.c.bf16 %v4260_v28, %v4259_v27  ;;  %v2103_v28 = vld [vmem:[#allocation12 + $0x20] sm:$0xff] }
 0x614   :  { %v5091_v49 = vpop.f32.mrb[10].mxu0 }
 0x615   :  { %v1698_v50 = vadd.f32 %v5091_v49, %v4252_v48  ;;  %v1679_v51 = vpop.f32.mrb[11].mxu0 }
 0x616   :  { %v1697_v52 = vadd.f32 %v4252_v48, %v1679_v51 }
 0x618   :  { %v5827_v53 = vpack.c.bf16 %v1698_v50, %v1697_v52 }
 0x61a   :  { %5828 = vmatpush3.bf16.msra.mxu1 %v5827_v53 }
 0x61b   :  { %5829 = vmatprep.subr.bf16.mxu1 %v6459_v46 }
 0x61d   :  { %5097 = vmatmul.mubr.msk.f32.vlgmr.msra.gmra.mrb[20].mxu1 %vm1168_vm1, %v1699_v54  ;;  %v2183_v54 = vld [vmem:[#allocation12 + $0x40] sm:$0xff] }
 0x61e   :  { %5831 = vmatpush3.bf16.msra.mxu1 %v5827_v53  ;;  %5103 = vmatprep.mubr.msk.f32.mxu1 %vm6460_vm3, %v6461_v47  ;;  %v2024_v53 = vld [vmem:[#allocation10] sm:$0xff] }
 0x61f   :  { %5832 = vmatprep.subr.bf16.mxu1 %v6459_v46 }
 0x621   :  { %5104 = vmatmul.mubr.msk.f32.vlgmr.msra.gmra.mrb[22].mxu1 %vm1168_vm1, %v1774_v57  ;;  %v2108_v57 = vld [vmem:[#allocation10 + $0x8] sm:$0xff] }
 0x622   :  { %5834 = vmatpush3.bf16.msra.mxu1 %v5833_v58  ;;  %5138 = vmatprep.mubr.msk.f32.mxu1 %vm6460_vm3, %v6461_v47  ;;  %v5881_v58 = vpack.c.bf16 %v2184_v55, %v2183_v54  ;;  %v4320_v54 = vld [vmem:[%s7654_s14 + $0x30] sm:$0xff] }
 0x623   :  { %5835 = vmatprep.subr.bf16.mxu1 %v6459_v46 }
 0x626   :  { %5837 = vmatpush3.bf16.msra.mxu1 %v5836_v61  ;;  %v5884_v61 = vpack.c.bf16 %v2186_v60, %v2185_v59  ;;  %v4288_v59 = vld [vmem:[%s7655_s15 + $0xa0] sm:$0xff]  ;;  %v4289_v60 = vld [vmem:[%s7655_s15 + $0xa8] sm:$0xff] }
 0x627   :  { %5838 = vmatprep.subr.bf16.mxu1 %v6459_v46 }
 0x62a   :  { %5840 = vmatpush3.bf16.msra.mxu1 %v5839_v0  ;;  %v5887_v0 = vpack.c.bf16 %v2188_v63, %v2187_v62  ;;  %v4290_v62 = vld [vmem:[%s7655_s15 + $0xb0] sm:$0xff]  ;;  %v4291_v63 = vld [vmem:[%s7655_s15 + $0xb8] sm:$0xff] }
 0x62b   :  { %5841 = vmatprep.subr.bf16.mxu1 %v6459_v46 }
 0x62e   :  { %5843 = vmatpush3.bf16.msra.mxu1 %v5842_v3  ;;  %v5890_v3 = vpack.c.bf16 %v2190_v2, %v2189_v1  ;;  %v4292_v1 = vld [vmem:[%s7655_s15 + $0xc0] sm:$0xff]  ;;  %v4293_v2 = vld [vmem:[%s7655_s15 + $0xc8] sm:$0xff] }
 0x62f   :  { %5844 = vmatprep.subr.bf16.mxu1 %v6459_v46 }
 0x632   :  { %5846 = vmatpush3.bf16.msra.mxu1 %v5845_v6  ;;  %v5905_v6 = vpack.c.bf16 %v2414_v5, %v2413_v4  ;;  %v4294_v4 = vld [vmem:[%s7655_s15 + $0xd0] sm:$0xff]  ;;  %v4295_v5 = vld [vmem:[%s7655_s15 + $0xd8] sm:$0xff] }
 0x633   :  { %5847 = vmatprep.subr.bf16.mxu1 %v6459_v46 }
 0x636   :  { %5849 = vmatpush3.bf16.msra.mxu1 %v5848_v9  ;;  %v5908_v9 = vpack.c.bf16 %v2416_v8, %v2415_v7  ;;  %v4296_v7 = vld [vmem:[%s7655_s15 + $0xe0] sm:$0xff]  ;;  %v4297_v8 = vld [vmem:[%s7655_s15 + $0xe8] sm:$0xff] }
 0x637   :  { %5850 = vmatprep.subr.bf16.mxu1 %v6459_v46 }
 0x63a   :  { %5852 = vmatpush3.bf16.msra.mxu1 %v5851_v12  ;;  %v5911_v12 = vpack.c.bf16 %v2418_v11, %v2417_v10  ;;  %v4298_v10 = vld [vmem:[%s7655_s15 + $0xf0] sm:$0xff]  ;;  %v4299_v11 = vld [vmem:[%s7655_s15 + $0xf8] sm:$0xff] }
 0x63b   :  { %5853 = vmatprep.subr.bf16.mxu1 %v6459_v46 }
 0x63e   :  { %5855 = vmatpush3.bf16.msra.mxu1 %v5854_v15  ;;  %v5914_v15 = vpack.c.bf16 %v2420_v14, %v2419_v13  ;;  %v2587_v13 = vld [vmem:[%s7655_s15] sm:$0xff]  ;;  %v2588_v14 = vld [vmem:[%s7655_s15 + $0x8] sm:$0xff] }
 0x63f   :  { %5856 = vmatprep.subr.bf16.mxu1 %v6459_v46 }
 0x6f0   :  { %v1769_v16 = vpop.f32.mrb[20].mxu1 }
 0x6f1   :  { %v5098_v17 = vpop.f32.mrb[21].mxu1 }
 0x6f2   :  { %v2100_v17 = vld [vmem:[#allocation12 + $0x8] sm:$0xff] }
 0x6f4   :  { %v1844_v20 = vpop.f32.mrb[22].mxu1 }
 0x6f5   :  { %v1848_v22 = vmax.f32 %v1769_v16, %v1844_v20  ;;  %v5105_v23 = vpop.f32.mrb[23].mxu1  ;;  %v2099_v16 = vld [vmem:[#allocation12] sm:$0xff] }
 0x6f6   :  { %v5893_v20 = vpack.c.bf16 %v2100_v17, %v2099_v16  ;;  %v2102_v23 = vld [vmem:[#allocation12 + $0x18] sm:$0xff] }
 0x6f7   :  { %5139 = vmatmul.mubr.f32.vlgmr.msra.gmra.mrb[24].mxu1 %v1848_v22 }
 0x6f8   :  { %5858 = vmatpush3.bf16.msra.mxu1 %v5857_v21  ;;  %5173 = vmatprep.mubr.msk.f32.mxu1 %vm6460_vm3, %v6461_v47 }
 0x6f9   :  { %5859 = vmatprep.subr.bf16.mxu1 %v6459_v46 }
 0x6fc   :  { %5861 = vmatpush3.bf16.msra.mxu1 %v5860_v26 }
 0x6fd   :  { %5862 = vmatprep.subr.bf16.mxu1 %v6459_v46 }
 0x700   :  { %5864 = vmatpush3.bf16.msra.mxu1 %v5863_v29  ;;  %v2104_v29 = vld [vmem:[#allocation12 + $0x28] sm:$0xff] }
 0x701   :  { %5865 = vmatprep.subr.bf16.mxu1 %v6459_v46  ;;  %v5899_v30 = vpack.c.bf16 %v2104_v29, %v2103_v28 }
 0x704   :  { %5867 = vmatpush3.bf16.msra.mxu1 %v5866_v32  ;;  %v2106_v32 = vld [vmem:[#allocation12 + $0x38] sm:$0xff] }
 0x705   :  { %5868 = vmatprep.subr.bf16.mxu1 %v6459_v46  ;;  %v5902_v33 = vpack.c.bf16 %v2106_v32, %v2105_v31  ;;  %v2594_v31 = vld [vmem:[%s7655_s15 + $0x38] sm:$0xff] }
 0x708   :  { %5870 = vmatpush3.bf16.msra.mxu1 %v5869_v35 }
 0x709   :  { %5871 = vmatprep.subr.bf16.mxu1 %v6459_v46 }
 0x70c   :  { %5873 = vmatpush3.bf16.msra.mxu1 %v5872_v38 }
 0x70d   :  { %5874 = vmatprep.subr.bf16.mxu1 %v6459_v46 }
 0x710   :  { %5876 = vmatpush3.bf16.msra.mxu1 %v5875_v41  ;;  %v4277_v41 = vld [vmem:[%s7653_s13] ss:$0 sm:$0xff] }
 0x711   :  { %5877 = vmatprep.subr.bf16.mxu1 %v6459_v46 }
 0x714   :  { %5879 = vmatpush3.bf16.msra.mxu1 %v5878_v44 }
 0x715   :  { %5224 = vmatprep.subr.mxu1 %v6461_v47 }
 0x717   :  { %5174 = vmatmul.mubr.f32.vlgmr.msra.gmra.mrb[26].mxu1 %v1848_v22  ;;  %v2101_v22 = vld [vmem:[#allocation12 + $0x10] sm:$0xff] }
 0x718   :  { %5226 = vmatprep.mubr.msk.f32.mxu1 %vm6460_vm3, %v6461_v47  ;;  %v5896_v27 = vpack.c.bf16 %v2102_v23, %v2101_v22 }
 0x7ca   :  { %v1931_v45 = vpop.f32.mrb[24].mxu1 }
 0x7cb   :  { %v5140_v48 = vpop.f32.mrb[25].mxu1 }
 0x7cc   :  { %v4284_v48 = vld [vmem:[%s7655_s15 + $0x80] sm:$0xff] }
 0x7ea   :  { %v2018_v49 = vpop.f32.mrb[26].mxu1 }
 0x7eb   :  { %v2022_v50 = vmax.f32 %v1931_v45, %v2018_v49  ;;  %v5175_v51 = vpop.f32.mrb[27].mxu1  ;;  %v2505_v45 = vld [vmem:[%s7654_s14 + $0x8] sm:$0xff] }
 0x7ec   :  { %v4285_v49 = vld [vmem:[%s7655_s15 + $0x88] sm:$0xff]  ;;  %v4280_v51 = vld [vmem:[%s7654_s14 + $0x10] sm:$0xff] }
 0x7ed   :  { %v2023_v52 = vmax.f32 %v2022_v50, 0.0  ;;  %v4301_v50 = vld [vmem:[%s7654_s14 + $0x28] sm:$0xff]  ;;  %v5916_v55 = vpack.c.bf16 %v4285_v49, %v4284_v48  ;;  %v4306_v48 = vld [vmem:[%s7655_s15 + $0x110] sm:$0xff]  ;;  %v4307_v49 = vld [vmem:[%s7655_s15 + $0x118] sm:$0xff] }
 0x7ef   :  { %5177 = vmatpush3.msra.mxu0 %v2023_v52  ;;  %5225 = vmatpush3.msra.mxu1 %v2023_v52 }
 0x7f0   :  { %5179 = vmatmul.mubr.msk.f32.vlgmr.msra.gmra.mrb[12].mxu0 %vm2025_vm4, %v2024_v53  ;;  %5181 = vmatprep.subr.mxu0 %v6461_v47  ;;  %v4287_v53 = vld [vmem:[%s7655_s15 + $0x98] sm:$0xff] }
 0x7f1   :  { %5182 = vmatpush3.msra.mxu0 %v2023_v52  ;;  %5183 = vmatprep.mubr.msk.f32.mxu0 %vm6460_vm3, %v6461_v47  ;;  %v4286_v52 = vld [vmem:[%s7655_s15 + $0x90] sm:$0xff] }
 0x7f2   :  { %5227 = vmatmul.mubr.msk.f32.vlgmr.msra.gmra.mrb[28].mxu1 %vm2025_vm4, %v2338_v56  ;;  %5880 = vmatprep.subr.bf16.mxu0 %v6459_v46  ;;  %v4281_v56 = vld [vmem:[%s7654_s14 + $0x18] sm:$0xff] }
 0x7f3   :  { %5904 = vmatprep.subr.bf16.mxu1 %v6459_v46  ;;  %5245 = vmatprep.mubr.msk.f32.mxu1 %vm6460_vm3, %v6461_v47 }
 0x7f4   :  { %5184 = vmatmul.mubr.msk.f32.vlgmr.msra.gmra.mrb[14].mxu0 %vm2025_vm4, %v2108_v57  ;;  %5906 = vmatpush3.bf16.msra.mxu1 %v5905_v6  ;;  %v5920_v57 = vpack.c.bf16 %v4287_v53, %v4286_v52  ;;  %v5936_v6 = vpack.c.bf16 %v4295_v5, %v4294_v4  ;;  %v4309_v52 = vld [vmem:[%s7655_s15 + $0x128] sm:$0xff]  ;;  %v4324_v5 = vld [vmem:[%s7655_s15 + $0x180] sm:$0xff] }
 0x7f5   :  { %5882 = vmatpush3.bf16.msra.mxu0 %v5881_v58  ;;  %5202 = vmatprep.mubr.msk.f32.mxu0 %vm6460_vm3, %v6461_v47  ;;  %v4321_v58 = vld [vmem:[%s7654_s14 + $0x38] sm:$0xff] }
 0x7f6   :  { %5883 = vmatprep.subr.bf16.mxu0 %v6459_v46  ;;  %5907 = vmatprep.subr.bf16.mxu1 %v6459_v46 }
 0x7f8   :  { %5909 = vmatpush3.bf16.msra.mxu1 %v5908_v9  ;;  %v5940_v9 = vpack.c.bf16 %v4297_v8, %v4296_v7  ;;  %v4326_v8 = vld [vmem:[%s7655_s15 + $0x190] sm:$0xff] }
 0x7f9   :  { %5885 = vmatpush3.bf16.msra.mxu0 %v5884_v61  ;;  %5910 = vmatprep.subr.bf16.mxu1 %v6459_v46  ;;  %v5924_v61 = vpack.c.bf16 %v4289_v60, %v4288_v59  ;;  %v4314_v60 = vld [vmem:[%s7655_s15 + $0x150] sm:$0xff] }
 0x7fa   :  { %5886 = vmatprep.subr.bf16.mxu0 %v6459_v46 }
 0x7fc   :  { %5912 = vmatpush3.bf16.msra.mxu1 %v5911_v12  ;;  %v5944_v12 = vpack.c.bf16 %v4299_v11, %v4298_v10  ;;  %v4328_v11 = vld [vmem:[%s7655_s15 + $0x1a0] sm:$0xff] }
 0x7fd   :  { %5888 = vmatpush3.bf16.msra.mxu0 %v5887_v0  ;;  %5913 = vmatprep.subr.bf16.mxu1 %v6459_v46  ;;  %v5928_v0 = vpack.c.bf16 %v4291_v63, %v4290_v62  ;;  %v4316_v63 = vld [vmem:[%s7655_s15 + $0x160] sm:$0xff] }
 0x7fe   :  { %5889 = vmatprep.subr.bf16.mxu0 %v6459_v46 }
 0x800   :  { %5915 = vmatpush3.bf16.msra.mxu1 %v5914_v15  ;;  %v5948_v15 = vpack.c.bf16 %v2588_v14, %v2587_v13  ;;  %v4330_v14 = vld [vmem:[%s7655_s15 + $0x1b0] sm:$0xff] }
 0x801   :  { %5891 = vmatpush3.bf16.msra.mxu0 %v5890_v3  ;;  %v5932_v3 = vpack.c.bf16 %v4293_v2, %v4292_v1  ;;  %v4318_v2 = vld [vmem:[%s7655_s15 + $0x170] sm:$0xff] }
 0x802   :  { %5892 = vmatprep.subr.bf16.mxu0 %v6459_v46 }
 0x8c3   :  { %v2095_v18 = vpop.f32.mrb[12].mxu0 }
 0x8c4   :  { %v5180_v19 = vpop.f32.mrb[13].mxu0 }
 0x8c5   :  { %v2408_v21 = vpop.f32.mrb[28].mxu1  ;;  %v2590_v19 = vld [vmem:[%s7655_s15 + $0x18] sm:$0xff] }
 0x8c6   :  { %v5228_v24 = vpop.f32.mrb[29].mxu1  ;;  %5246 = vmatmul.mubr.msk.f32.vlgmr.msra.gmra.mrb[30].mxu1 %vm1351_vm2, %v2408_v21 }
 0x8c7   :  { %v2178_v25 = vpop.f32.mrb[14].mxu0  ;;  %5330 = vmatprep.mubr.msk.f32.mxu1 %vm2025_vm4, %v4300_v34 }
 0x8c8   :  { %v5185_v26 = vpop.f32.mrb[15].mxu0  ;;  %5203 = vmatmul.mubr.msk.f32.vlgmr.msra.gmra.mrb[16].mxu0 %vm1351_vm2, %v2178_v25  ;;  %v2591_v25 = vld [vmem:[%s7655_s15 + $0x20] sm:$0xff] }
 0x8c9   :  { %5894 = vmatpush3.bf16.msra.mxu0 %v5893_v20  ;;  %5221 = vmatprep.mubr.msk.f32.mxu0 %vm6460_vm3, %v6461_v47  ;;  %v2504_v47 = vld [vmem:[%s7654_s14] sm:$0xff]  ;;  %v2592_v26 = vld [vmem:[%s7655_s15 + $0x28] sm:$0xff] }
 0x8ca   :  { %5895 = vmatprep.subr.bf16.mxu0 %v6459_v46  ;;  %v5956_v29 = vpack.c.bf16 %v2592_v26, %v2591_v25  ;;  %v4338_v26 = vld [vmem:[%s7655_s15 + $0x1f0] sm:$0xff] }
 0x8cd   :  { %5897 = vmatpush3.bf16.msra.mxu0 %v5896_v27 }
 0x8ce   :  { %5898 = vmatprep.subr.bf16.mxu0 %v6459_v46 }
 0x8d1   :  { %5900 = vmatpush3.bf16.msra.mxu0 %v5899_v30  ;;  %v2593_v30 = vld [vmem:[%s7655_s15 + $0x30] sm:$0xff] }
 0x8d2   :  { %5901 = vmatprep.subr.bf16.mxu0 %v6459_v46  ;;  %v5960_v32 = vpack.c.bf16 %v2594_v31, %v2593_v30  ;;  %v3221_v30 = vld [vmem:[%s7657_s17] sm:$0xff] }
 0x8d3   :  { %v4340_v31 = vld [vmem:[%s7656_s16] ss:$0 sm:$0xff] }
 0x8d5   :  { %5903 = vmatpush3.bf16.msra.mxu0 %v5902_v33  ;;  %v2595_v33 = vld [vmem:[%s7655_s15 + $0x40] sm:$0xff] }
 0x8d8   :  { %5222 = vmatmul.mubr.msk.f32.vlgmr.msra.gmra.mrb[18].mxu0 %vm1351_vm2, %v2095_v18  ;;  %v2589_v18 = vld [vmem:[%s7655_s15 + $0x10] sm:$0xff] }
 0x8d9   :  { %5250 = vmatprep.mubr.msk.f32.mxu0 %vm2025_vm4, %v2504_v47  ;;  %v5952_v24 = vpack.c.bf16 %v2590_v19, %v2589_v18  ;;  %v2596_v47 = vld [vmem:[%s7655_s15 + $0x48] sm:$0xff] }
 0x8da   :  { %v5964_v34 = vpack.c.bf16 %v2596_v47, %v2595_v33  ;;  %v4333_v18 = vld [vmem:[%s7655_s15 + $0x1c8] sm:$0xff] }
 0x999   :  { %v2490_v35 = vpop.f32.mrb[30].mxu1 }
 0x99a   :  { %v5247_v36 = vpop.f32.mrb[31].mxu1 }
 0x99b   :  { %v2260_v37 = vpop.f32.mrb[16].mxu0  ;;  %v2598_v36 = vld [vmem:[%s7655_s15 + $0x58] sm:$0xff] }
 0x99c   :  { %v5204_v38 = vpop.f32.mrb[17].mxu0 }
 0x99d   :  { %v2599_v38 = vld [vmem:[%s7655_s15 + $0x60] sm:$0xff] }
 0x9ab   :  { %v2333_v46 = vpop.f32.mrb[18].mxu0 }
 0x9ac   :  { %v2334_v39 = vadd.f32 %v2333_v46, %v2260_v37  ;;  %v5223_v40 = vpop.f32.mrb[19].mxu0  ;;  %v2600_v46 = vld [vmem:[%s7655_s15 + $0x68] sm:$0xff] }
 0x9ad   :  { %v2601_v40 = vld [vmem:[%s7655_s15 + $0x70] sm:$0xff] }
 0x9ae   :  { %v2494_v42 = vadd.f32 %v2490_v35, %v2334_v39  ;;  %v2597_v35 = vld [vmem:[%s7655_s15 + $0x50] sm:$0xff]  ;;  %v5972_v39 = vpack.c.bf16 %v2600_v46, %v2599_v38  ;;  %v4354_v38 = vld [vmem:[%s7658_s18 + $0x88] sm:$0xff] }
 0x9af   :  { %v5968_v37 = vpack.c.bf16 %v2598_v36, %v2597_v35  ;;  %v3222_v46 = vld [vmem:[%s7657_s17 + $0x8] sm:$0xff] }
 0x9b0   :  { %v2502_v43 = vadd.f32 %v4277_v41, %v2494_v42  ;;  %v2602_v41 = vld [vmem:[%s7655_s15 + $0x78] sm:$0xff] }
 0x9b1   :  { %v5976_v42 = vpack.c.bf16 %v2602_v41, %v2601_v40  ;;  %v3224_v41 = vld [vmem:[%s7657_s17 + $0x18] sm:$0xff] }
 0x9b2   :  { %v2503_v44 = vmax.f32 %v2502_v43, 0.0  ;;  %v4304_v43 = vld [vmem:[%s7655_s15 + $0x100] sm:$0xff] }
 0x9b4   :  { %5248 = vmatprep.subr.mxu0 %v2503_v44  ;;  %5328 = vmatprep.subr.mxu1 %v2503_v44 }
 0x9b5   :  { %5249 = vmatpush3.msra.mxu0 %v2503_v44  ;;  %5329 = vmatpush3.msra.mxu1 %v2503_v44 }
 0x9b6   :  { %5251 = vmatmul.mubr.msk.f32.vlgmr.msra.gmra.mrb[20].mxu0 %vm2025_vm4, %v2505_v45  ;;  %5253 = vmatprep.subr.mxu0 %v2503_v44 }
 0x9b7   :  { %5368 = vmatprep.subr.mxu1 %v2503_v44  ;;  %5254 = vmatpush3.msra.mxu0 %v2503_v44 }
 0x9b8   :  { %5331 = vmatmul.mubr.msk.f32.vlgmr.msra.gmra.mrb[32].mxu1 %vm2025_vm4, %v4301_v50  ;;  %5255 = vmatprep.mubr.msk.f32.mxu0 %vm2025_vm4, %v4280_v51  ;;  %v5984_v50 = vpack.c.bf16 %v4307_v49, %v4306_v48  ;;  %v4308_v51 = vld [vmem:[%s7655_s15 + $0x120] sm:$0xff]  ;;  %v4347_v48 = vld [vmem:[%s7657_s17 + $0x30] sm:$0xff] }
 0x9b9   :  { %5369 = vmatpush3.msra.mxu1 %v2503_v44  ;;  %5370 = vmatprep.mubr.msk.f32.mxu1 %vm2025_vm4, %v4320_v54  ;;  %v4305_v44 = vld [vmem:[%s7655_s15 + $0x108] sm:$0xff]  ;;  %v5988_v53 = vpack.c.bf16 %v4309_v52, %v4308_v51  ;;  %v4310_v54 = vld [vmem:[%s7655_s15 + $0x130] sm:$0xff]  ;;  %v4348_v52 = vld [vmem:[%s7657_s17 + $0x38] sm:$0xff] }
 0x9ba   :  { %5256 = vmatmul.mubr.msk.f32.vlgmr.msra.gmra.mrb[22].mxu0 %vm2025_vm4, %v4281_v56  ;;  %5917 = vmatprep.subr.bf16.mxu0 %v5916_v55  ;;  %v5980_v45 = vpack.c.bf16 %v4305_v44, %v4304_v43  ;;  %v4355_v43 = vld [vmem:[%s7658_s18 + $0x90] sm:$0xff]  ;;  %v4356_v44 = vld [vmem:[%s7658_s18 + $0x98] sm:$0xff]  ;;  %v4358_v51 = vld [vmem:[%s7658_s18 + $0xa8] sm:$0xff] }
 0x9bb   :  { %5919 = vmatpush3.bf16.msra.mxu0 %v5916_v55  ;;  %v4311_v55 = vld [vmem:[%s7655_s15 + $0x138] sm:$0xff]  ;;  %v6056_v49 = vpack.c.bf16 %v4356_v44, %v4355_v43  ;;  %v4369_v43 = vld [vmem:[%s7657_s17 + $0x40] sm:$0xff]  ;;  %v4379_v44 = vld [vmem:[%s7658_s18 + $0x110] sm:$0xff] }
 0x9bc   :  { %5371 = vmatmul.mubr.msk.f32.vlgmr.msra.gmra.mrb[34].mxu1 %vm2025_vm4, %v4321_v58  ;;  %5921 = vmatprep.subr.bf16.mxu0 %v5920_v57  ;;  %v5992_v56 = vpack.c.bf16 %v4311_v55, %v4310_v54  ;;  %v4313_v58 = vld [vmem:[%s7655_s15 + $0x148] sm:$0xff]  ;;  %v4359_v54 = vld [vmem:[%s7658_s18 + $0xb0] sm:$0xff]  ;;  %v4360_v55 = vld [vmem:[%s7658_s18 + $0xb8] sm:$0xff] }
 0x9bd   :  { %5412 = vmatprep.mubr.msk.f32.mxu1 %vm1168_vm1, %v3221_v30  ;;  %v3330_v30 = vld [vmem:[%s7658_s18 + $0x40] sm:$0xff] }
 0x9bf   :  { %5923 = vmatpush3.bf16.msra.mxu0 %v5920_v57  ;;  %v4312_v57 = vld [vmem:[%s7655_s15 + $0x140] sm:$0xff] }
 0x9c0   :  { %5925 = vmatprep.subr.bf16.mxu0 %v5924_v61  ;;  %v5996_v59 = vpack.c.bf16 %v4313_v58, %v4312_v57  ;;  %v4361_v57 = vld [vmem:[%s7658_s18 + $0xc0] sm:$0xff]  ;;  %v4362_v58 = vld [vmem:[%s7658_s18 + $0xc8] sm:$0xff] }
 0x9c3   :  { %5927 = vmatpush3.bf16.msra.mxu0 %v5924_v61  ;;  %v4315_v61 = vld [vmem:[%s7655_s15 + $0x158] sm:$0xff] }
 0x9c4   :  { %5929 = vmatprep.subr.bf16.mxu0 %v5928_v0  ;;  %v6000_v62 = vpack.c.bf16 %v4315_v61, %v4314_v60  ;;  %v4363_v60 = vld [vmem:[%s7658_s18 + $0xd0] sm:$0xff]  ;;  %v4364_v61 = vld [vmem:[%s7658_s18 + $0xd8] sm:$0xff] }
 0x9c7   :  { %5931 = vmatpush3.bf16.msra.mxu0 %v5928_v0  ;;  %v4317_v0 = vld [vmem:[%s7655_s15 + $0x168] sm:$0xff] }
 0x9c8   :  { %5933 = vmatprep.subr.bf16.mxu0 %v5932_v3  ;;  %v6004_v1 = vpack.c.bf16 %v4317_v0, %v4316_v63  ;;  %v4365_v63 = vld [vmem:[%s7658_s18 + $0xe0] sm:$0xff]  ;;  %v4366_v0 = vld [vmem:[%s7658_s18 + $0xe8] sm:$0xff] }
 0x9cb   :  { %5935 = vmatpush3.bf16.msra.mxu0 %v5932_v3  ;;  %v4319_v3 = vld [vmem:[%s7655_s15 + $0x178] sm:$0xff] }
 0x9cc   :  { %5937 = vmatprep.subr.bf16.mxu0 %v5936_v6  ;;  %v6008_v4 = vpack.c.bf16 %v4319_v3, %v4318_v2  ;;  %v4367_v2 = vld [vmem:[%s7658_s18 + $0xf0] sm:$0xff]  ;;  %v4368_v3 = vld [vmem:[%s7658_s18 + $0xf8] sm:$0xff] }
 0x9cf   :  { %5939 = vmatpush3.bf16.msra.mxu0 %v5936_v6  ;;  %v4325_v6 = vld [vmem:[%s7655_s15 + $0x188] sm:$0xff] }
 0x9d0   :  { %5941 = vmatprep.subr.bf16.mxu0 %v5940_v9  ;;  %v6012_v7 = vpack.c.bf16 %v4325_v6, %v4324_v5  ;;  %v3322_v5 = vld [vmem:[%s7658_s18] sm:$0xff]  ;;  %v3323_v6 = vld [vmem:[%s7658_s18 + $0x8] sm:$0xff] }
 0x9d3   :  { %5943 = vmatpush3.bf16.msra.mxu0 %v5940_v9  ;;  %v4327_v9 = vld [vmem:[%s7655_s15 + $0x198] sm:$0xff] }
 0x9d4   :  { %5945 = vmatprep.subr.bf16.mxu0 %v5944_v12  ;;  %v6016_v10 = vpack.c.bf16 %v4327_v9, %v4326_v8  ;;  %v4393_v8 = vld [vmem:[%s7657_s17 + $0x60] sm:$0xff]  ;;  %v4394_v9 = vld [vmem:[%s7657_s17 + $0x68] sm:$0xff] }
 0x9d7   :  { %5947 = vmatpush3.bf16.msra.mxu0 %v5944_v12  ;;  %v4329_v12 = vld [vmem:[%s7655_s15 + $0x1a8] sm:$0xff] }
 0x9d8   :  { %5949 = vmatprep.subr.bf16.mxu0 %v5948_v15  ;;  %v6020_v13 = vpack.c.bf16 %v4329_v12, %v4328_v11  ;;  %v4396_v11 = vld [vmem:[%s7657_s17 + $0x78] sm:$0xff] }
 0xa89   :  { %v5252_v16 = vpop.f32.mrb[20].mxu0 }
 0xa8a   :  { %v2578_v17 = vpop.f32.mrb[21].mxu0 }
 0xa8b   :  { %v7203_v20 = vpop.f32.mrb[32].mxu1 }
 0xa8c   :  { %v2929_v21 = vpop.f32.mrb[33].mxu1 }
 0xa8d   :  { %v5257_v22 = vpop.f32.mrb[22].mxu0 }
 0xa8e   :  { %v2678_v23 = vpop.f32.mrb[23].mxu0 }
 0xa8f   :  { %5290 = vmatprep.mubr.f32.mxu0 %v2678_v23  ;;  %v7211_v27 = vpop.f32.mrb[34].mxu1  ;;  %v4336_v23 = vld [vmem:[%s7655_s15 + $0x1e0] sm:$0xff] }
 0xa90   :  { %5291 = vmatmul.mubr.f32.vlgmr.msra.gmra.mrb[24].mxu0 %v5257_v22  ;;  %v7213_v28 = vpop.f32.mrb[35].mxu1 }
 0xa91   :  { %5951 = vmatpush3.bf16.msra.mxu0 %v5948_v15  ;;  %5325 = vmatprep.mubr.f32.mxu0 %v2578_v17  ;;  %v4331_v15 = vld [vmem:[%s7655_s15 + $0x1b8] sm:$0xff]  ;;  %v4332_v17 = vld [vmem:[%s7655_s15 + $0x1c0] sm:$0xff] }
 0xa92   :  { %5953 = vmatprep.subr.bf16.mxu0 %v5952_v24  ;;  %v6028_v19 = vpack.c.bf16 %v4333_v18, %v4332_v17  ;;  %v3325_v17 = vld [vmem:[%s7658_s18 + $0x18] sm:$0xff] }
 0xa95   :  { %5955 = vmatpush3.bf16.msra.mxu0 %v5952_v24  ;;  %v4337_v24 = vld [vmem:[%s7655_s15 + $0x1e8] sm:$0xff] }
 0xa96   :  { %5957 = vmatprep.subr.bf16.mxu0 %v5956_v29  ;;  %v6036_v25 = vpack.c.bf16 %v4337_v24, %v4336_v23 }
 0xa99   :  { %5959 = vmatpush3.bf16.msra.mxu0 %v5956_v29 }
 0xa9a   :  { %5961 = vmatprep.subr.bf16.mxu0 %v5960_v32 }
 0xa9d   :  { %5963 = vmatpush3.bf16.msra.mxu0 %v5960_v32 }
 0xa9e   :  { %5965 = vmatprep.subr.bf16.mxu0 %v5964_v34 }
 0xaa1   :  { %5967 = vmatpush3.bf16.msra.mxu0 %v5964_v34 }
 0xaa2   :  { %5969 = vmatprep.subr.bf16.mxu0 %v5968_v37 }
 0xaa5   :  { %5971 = vmatpush3.bf16.msra.mxu0 %v5968_v37 }
 0xaa6   :  { %5973 = vmatprep.subr.bf16.mxu0 %v5972_v39 }
 0xaa9   :  { %5975 = vmatpush3.bf16.msra.mxu0 %v5972_v39  ;;  %v3223_v39 = vld [vmem:[%s7657_s17 + $0x10] sm:$0xff] }
 0xaaa   :  { %5977 = vmatprep.subr.bf16.mxu0 %v5976_v42 }
 0xaad   :  { %5979 = vmatpush3.bf16.msra.mxu0 %v5976_v42  ;;  %v4345_v42 = vld [vmem:[%s7657_s17 + $0x20] sm:$0xff] }
 0xaae   :  { %5981 = vmatprep.subr.bf16.mxu0 %v5980_v45 }
 0xab0   :  { %5326 = vmatmul.mubr.f32.vlgmr.msra.gmra.mrb[24].mxu0 %v5252_v16  ;;  %v6024_v16 = vpack.c.bf16 %v4331_v15, %v4330_v14 }
 0xab1   :  { %5983 = vmatpush3.bf16.msra.mxu0 %v5980_v45  ;;  %5365 = vmatprep.mubr.f32.mxu0 %v2929_v21  ;;  %v4335_v21 = vld [vmem:[%s7655_s15 + $0x1d8] sm:$0xff]  ;;  %v4346_v45 = vld [vmem:[%s7657_s17 + $0x28] sm:$0xff] }
 0xab2   :  { %5985 = vmatprep.subr.bf16.mxu0 %v5984_v50 }
 0xab5   :  { %5987 = vmatpush3.bf16.msra.mxu0 %v5984_v50  ;;  %v4357_v50 = vld [vmem:[%s7658_s18 + $0xa0] sm:$0xff] }
 0xab6   :  { %5989 = vmatprep.subr.bf16.mxu0 %v5988_v53 }
 0xab9   :  { %5991 = vmatpush3.bf16.msra.mxu0 %v5988_v53  ;;  %v6060_v53 = vpack.c.bf16 %v4358_v51, %v4357_v50  ;;  %v4381_v50 = vld [vmem:[%s7658_s18 + $0x120] sm:$0xff]  ;;  %v4382_v51 = vld [vmem:[%s7658_s18 + $0x128] sm:$0xff] }
 0xaba   :  { %5993 = vmatprep.subr.bf16.mxu0 %v5992_v56 }
 0xabd   :  { %5995 = vmatpush3.bf16.msra.mxu0 %v5992_v56  ;;  %v6064_v56 = vpack.c.bf16 %v4360_v55, %v4359_v54  ;;  %v4383_v54 = vld [vmem:[%s7658_s18 + $0x130] sm:$0xff]  ;;  %v4384_v55 = vld [vmem:[%s7658_s18 + $0x138] sm:$0xff] }
 0xabe   :  { %5997 = vmatprep.subr.bf16.mxu0 %v5996_v59 }
 0xac1   :  { %5999 = vmatpush3.bf16.msra.mxu0 %v5996_v59  ;;  %v6068_v59 = vpack.c.bf16 %v4362_v58, %v4361_v57  ;;  %v4385_v57 = vld [vmem:[%s7658_s18 + $0x140] sm:$0xff]  ;;  %v4386_v58 = vld [vmem:[%s7658_s18 + $0x148] sm:$0xff] }
 0xac2   :  { %6001 = vmatprep.subr.bf16.mxu0 %v6000_v62 }
 0xac5   :  { %6003 = vmatpush3.bf16.msra.mxu0 %v6000_v62  ;;  %v6072_v62 = vpack.c.bf16 %v4364_v61, %v4363_v60  ;;  %v4387_v60 = vld [vmem:[%s7658_s18 + $0x150] sm:$0xff]  ;;  %v4388_v61 = vld [vmem:[%s7658_s18 + $0x158] sm:$0xff] }
 0xac6   :  { %6005 = vmatprep.subr.bf16.mxu0 %v6004_v1 }
 0xac9   :  { %6007 = vmatpush3.bf16.msra.mxu0 %v6004_v1  ;;  %v6076_v1 = vpack.c.bf16 %v4366_v0, %v4365_v63  ;;  %v4389_v63 = vld [vmem:[%s7658_s18 + $0x160] sm:$0xff]  ;;  %v4390_v0 = vld [vmem:[%s7658_s18 + $0x168] sm:$0xff] }
 0xaca   :  { %6009 = vmatprep.subr.bf16.mxu0 %v6008_v4 }
 0xacd   :  { %6011 = vmatpush3.bf16.msra.mxu0 %v6008_v4  ;;  %v6080_v4 = vpack.c.bf16 %v4368_v3, %v4367_v2  ;;  %v4391_v2 = vld [vmem:[%s7658_s18 + $0x170] sm:$0xff]  ;;  %v4392_v3 = vld [vmem:[%s7658_s18 + $0x178] sm:$0xff] }
 0xace   :  { %6013 = vmatprep.subr.bf16.mxu0 %v6012_v7 }
 0xad0   :  { %5366 = vmatmul.mubr.f32.vlgmr.msra.gmra.mrb[24].mxu0 %v7203_v20  ;;  %v4334_v20 = vld [vmem:[%s7655_s15 + $0x1d0] sm:$0xff] }
 0xad1   :  { %6015 = vmatpush3.bf16.msra.mxu0 %v6012_v7  ;;  %5405 = vmatprep.mubr.f32.mxu0 %v7213_v28  ;;  %v6032_v22 = vpack.c.bf16 %v4335_v21, %v4334_v20  ;;  %v4339_v28 = vld [vmem:[%s7655_s15 + $0x1f8] sm:$0xff]  ;;  %v6084_v7 = vpack.c.bf16 %v3323_v6, %v3322_v5  ;;  %v3326_v21 = vld [vmem:[%s7658_s18 + $0x20] sm:$0xff]  ;;  %v4402_v6 = vld [vmem:[%s7658_s18 + $0x188] sm:$0xff] }
 0xad2   :  { %6017 = vmatprep.subr.bf16.mxu0 %v6016_v10  ;;  %v6040_v29 = vpack.c.bf16 %v4339_v28, %v4338_v26  ;;  %v3328_v26 = vld [vmem:[%s7658_s18 + $0x30] sm:$0xff]  ;;  %v3329_v28 = vld [vmem:[%s7658_s18 + $0x38] sm:$0xff]  ;;  %v4401_v5 = vld [vmem:[%s7658_s18 + $0x180] sm:$0xff] }
 0xad5   :  { %6019 = vmatpush3.bf16.msra.mxu0 %v6016_v10  ;;  %v4395_v10 = vld [vmem:[%s7657_s17 + $0x70] sm:$0xff] }
 0xad6   :  { %6021 = vmatprep.subr.bf16.mxu0 %v6020_v13 }
 0xad9   :  { %6023 = vmatpush3.bf16.msra.mxu0 %v6020_v13 }
 0xada   :  { %6025 = vmatprep.subr.bf16.mxu0 %v6024_v16 }
 0xadd   :  { %6027 = vmatpush3.bf16.msra.mxu0 %v6024_v16  ;;  %v3324_v16 = vld [vmem:[%s7658_s18 + $0x10] sm:$0xff] }
 0xade   :  { %6029 = vmatprep.subr.bf16.mxu0 %v6028_v19  ;;  %v6088_v20 = vpack.c.bf16 %v3325_v17, %v3324_v16  ;;  %v4061_v16 = vld [vmem:[#allocation13 + $0x18] sm:$0xff] }
 0xae1   :  { %6031 = vmatpush3.bf16.msra.mxu0 %v6028_v19 }
 0xae2   :  { %6033 = vmatprep.subr.bf16.mxu0 %v6032_v22 }
 0xae5   :  { %6035 = vmatpush3.bf16.msra.mxu0 %v6032_v22  ;;  %v3327_v22 = vld [vmem:[%s7658_s18 + $0x28] sm:$0xff] }
 0xae6   :  { %6037 = vmatprep.subr.bf16.mxu0 %v6036_v25 }
 0xae9   :  { %6039 = vmatpush3.bf16.msra.mxu0 %v6036_v25  ;;  %v6092_v25 = vpack.c.bf16 %v3327_v22, %v3326_v21  ;;  %v4064_v21 = vld [vmem:[#allocation13 + $0x30] sm:$0xff]  ;;  %v4065_v22 = vld [vmem:[#allocation13 + $0x38] sm:$0xff] }
 0xaea   :  { %6041 = vmatprep.subr.bf16.mxu0 %v6040_v29 }
 0xaed   :  { %6043 = vmatpush3.bf16.msra.mxu0 %v6040_v29  ;;  %v6096_v29 = vpack.c.bf16 %v3329_v28, %v3328_v26  ;;  %v4068_v28 = vld [vmem:[#allocation13 + $0x50] sm:$0xff] }
 0xaf0   :  { %5406 = vmatmul.mubr.f32.vlgmr.msra.gmra.mrb[24].mxu0 %v7211_v27  ;;  %v4353_v27 = vld [vmem:[%s7658_s18 + $0x80] sm:$0xff] }
 0xaf1   :  { %v6052_v40 = vpack.c.bf16 %v4354_v38, %v4353_v27  ;;  %5556 = vmatprep.mubr.msk.f32.mxu0 %vm1168_vm1, %v4393_v8  ;;  %v3336_v38 = vld [vmem:[%s7658_s18 + $0x70] sm:$0xff] }
 0xbc3   :  { %v5407_v32 = vpop.f32.mrb[24].mxu0 }
 0xbc4   :  { %v3218_v33 = vadd.f32 %v5407_v32, %v4340_v31  ;;  %v3199_v47 = vpop.f32.mrb[25].mxu0 }
 0xbc5   :  { %v3217_v34 = vadd.f32 %v4340_v31, %v3199_v47  ;;  %v3331_v31 = vld [vmem:[%s7658_s18 + $0x48] sm:$0xff]  ;;  %v3333_v47 = vld [vmem:[%s7658_s18 + $0x58] sm:$0xff] }
 0xbc6   :  { %v3220_v35 = vmax.f32 %v3218_v33, 0.0  ;;  %v6100_v32 = vpack.c.bf16 %v3331_v31, %v3330_v30  ;;  %v3332_v33 = vld [vmem:[%s7658_s18 + $0x50] sm:$0xff]  ;;  %v4070_v31 = vld [vmem:[#allocation13 + $0x60] sm:$0xff] }
 0xbc7   :  { %v3219_v36 = vmax.f32 %v3217_v34, 0.0  ;;  %v6104_v34 = vpack.c.bf16 %v3333_v47, %v3332_v33  ;;  %v4403_v47 = vld [vmem:[%s7658_s18 + $0x190] sm:$0xff] }
 0xbc9   :  { %v7351_v37 = vpack.c.bf16 %v3220_v35, %v3219_v36  ;;  %v3334_v35 = vld [vmem:[%s7658_s18 + $0x60] sm:$0xff]  ;;  %v3335_v36 = vld [vmem:[%s7658_s18 + $0x68] sm:$0xff] }
 0xbca   :  { %v6108_v27 = vpack.c.bf16 %v3335_v36, %v3334_v35 }
 0xbcb   :  { %6045 = vmatprep.subr.bf16.mxu1 %v7351_v37  ;;  %6153 = vmatprep.subr.bf16.mxu0 %v7351_v37 }
 0xbcc   :  { %6047 = vmatpush3.bf16.msra.mxu1 %v7351_v37  ;;  %6155 = vmatpush3.bf16.msra.mxu0 %v7351_v37 }
 0xbcd   :  { %6049 = vmatprep.subr.bf16.mxu1 %v7351_v37 }
 0xbcf   :  { %5413 = vmatmul.mubr.msk.f32.vlgmr.msra.gmra.mrb[36].mxu1 %vm1168_vm1, %v3222_v46  ;;  %5557 = vmatmul.mubr.msk.f32.vlgmr.msra.gmra.mrb[26].mxu0 %vm1168_vm1, %v4394_v9  ;;  %v3337_v46 = vld [vmem:[%s7658_s18 + $0x78] sm:$0xff] }
 0xbd0   :  { %6051 = vmatpush3.bf16.msra.mxu1 %v7351_v37  ;;  %5415 = vmatprep.mubr.msk.f32.mxu1 %vm1168_vm1, %v3223_v39  ;;  %v6112_v39 = vpack.c.bf16 %v3337_v46, %v3336_v38  ;;  %v4405_v38 = vld [vmem:[%s7658_s18 + $0x1a0] sm:$0xff]  ;;  %v4406_v46 = vld [vmem:[%s7658_s18 + $0x1a8] sm:$0xff] }
 0xbd1   :  { %6053 = vmatprep.subr.bf16.mxu1 %v6052_v40  ;;  %5559 = vmatprep.mubr.msk.f32.mxu0 %vm1168_vm1, %v4395_v10 }
 0xbd3   :  { %5416 = vmatmul.mubr.msk.f32.gmra.mrb[38].mxu1 %vm1168_vm1, %v3224_v41  ;;  %5560 = vmatmul.mubr.msk.f32.gmra.mrb[28].mxu0 %vm1168_vm1, %v4396_v11  ;;  %v4378_v41 = vld [vmem:[%s7658_s18 + $0x108] sm:$0xff] }
 0xbd4   :  { %5422 = vmatprep.mubr.msk.f32.mxu1 %vm1168_vm1, %v4345_v42 }
 0xbd7   :  { %5423 = vmatmul.mubr.msk.f32.vlgmr.msra.gmra.mrb[40].mxu1 %vm1168_vm1, %v4346_v45  ;;  %v4380_v45 = vld [vmem:[%s7658_s18 + $0x118] sm:$0xff] }
 0xbd8   :  { %5425 = vmatprep.mubr.msk.f32.mxu1 %vm1168_vm1, %v4347_v48  ;;  %6055 = vmatpush3.bf16.msra.mxu1 %v6052_v40  ;;  %v4377_v40 = vld [vmem:[%s7658_s18 + $0x100] sm:$0xff]  ;;  %v4371_v48 = vld [vmem:[%s7657_s17 + $0x50] sm:$0xff] }
 0xbd9   :  { %6057 = vmatprep.subr.bf16.mxu1 %v6056_v49  ;;  %v6120_v42 = vpack.c.bf16 %v4378_v41, %v4377_v40  ;;  %v6164_v40 = vpack.c.bf16 %v4406_v46, %v4405_v38 }
 0xbdb   :  { %5426 = vmatmul.mubr.msk.f32.gmra.mrb[42].mxu1 %vm1168_vm1, %v4348_v52  ;;  %v4372_v52 = vld [vmem:[%s7657_s17 + $0x58] sm:$0xff] }
 0xbdc   :  { %6059 = vmatpush3.bf16.msra.mxu1 %v6056_v49  ;;  %v6124_v49 = vpack.c.bf16 %v4380_v45, %v4379_v44  ;;  %v4409_v45 = vld [vmem:[%s7658_s18 + $0x1c0] sm:$0xff] }
 0xbdd   :  { %6061 = vmatprep.subr.bf16.mxu1 %v6060_v53 }
 0xbe0   :  { %6063 = vmatpush3.bf16.msra.mxu1 %v6060_v53  ;;  %v6128_v53 = vpack.c.bf16 %v4382_v51, %v4381_v50  ;;  %v4412_v50 = vld [vmem:[%s7658_s18 + $0x1d8] sm:$0xff] }
 0xbe1   :  { %6065 = vmatprep.subr.bf16.mxu1 %v6064_v56 }
 0xbe4   :  { %6067 = vmatpush3.bf16.msra.mxu1 %v6064_v56  ;;  %v6132_v56 = vpack.c.bf16 %v4384_v55, %v4383_v54  ;;  %v4415_v55 = vld [vmem:[%s7658_s18 + $0x1f0] sm:$0xff] }
 0xbe5   :  { %6069 = vmatprep.subr.bf16.mxu1 %v6068_v59 }
 0xbe8   :  { %6071 = vmatpush3.bf16.msra.mxu1 %v6068_v59  ;;  %v6136_v59 = vpack.c.bf16 %v4386_v58, %v4385_v57  ;;  %v4072_v58 = vld [vmem:[#allocation13 + $0x70] sm:$0xff] }
 0xbe9   :  { %6073 = vmatprep.subr.bf16.mxu1 %v6072_v62 }
 0xbec   :  { %6075 = vmatpush3.bf16.msra.mxu1 %v6072_v62  ;;  %v6140_v62 = vpack.c.bf16 %v4388_v61, %v4387_v60  ;;  %v4417_v61 = vld [vmem:[%s7659_s19] ss:$0 sm:$0xff] }
 0xbed   :  { %6077 = vmatprep.subr.bf16.mxu1 %v6076_v1 }
 0xbf0   :  { %6079 = vmatpush3.bf16.msra.mxu1 %v6076_v1  ;;  %v6144_v1 = vpack.c.bf16 %v4390_v0, %v4389_v63 }
 0xbf1   :  { %6081 = vmatprep.subr.bf16.mxu1 %v6080_v4 }
 0xbf4   :  { %6083 = vmatpush3.bf16.msra.mxu1 %v6080_v4  ;;  %v6148_v4 = vpack.c.bf16 %v4392_v3, %v4391_v2 }
 0xbf5   :  { %6085 = vmatprep.subr.bf16.mxu1 %v6084_v7 }
 0xca2   :  { %v5414_v12 = vpop.f32.mrb[36].mxu1  ;;  %v7571_v8 = vpop.f32.mrb[26].mxu0 }
 0xca3   :  { %v3303_v13 = vpop.f32.mrb[37].mxu1  ;;  %v3918_v9 = vpop.f32.mrb[27].mxu0 }
 0xca6   :  { %v5417_v14 = vpop.f32.mrb[38].mxu1  ;;  %v7573_v10 = vpop.f32.mrb[28].mxu0 }
 0xca7   :  { %v3313_v15 = vpop.f32.mrb[39].mxu1  ;;  %v7575_v11 = vpop.f32.mrb[29].mxu0 }
 0xcaa   :  { %v5424_v18 = vpop.f32.mrb[40].mxu1 }
 0xcab   :  { %v3421_v19 = vpop.f32.mrb[41].mxu1 }
 0xcac   :  { %5460 = vmatprep.mubr.f32.mxu1 %v3421_v19  ;;  %v4063_v19 = vld [vmem:[#allocation13 + $0x28] sm:$0xff] }
 0xcad   :  { %5461 = vmatmul.mubr.f32.vlgmr.msra.gmra.mrb[44].mxu1 %v5424_v18  ;;  %v4062_v18 = vld [vmem:[#allocation13 + $0x20] sm:$0xff] }
 0xcae   :  { %6087 = vmatpush3.bf16.msra.mxu1 %v6084_v7  ;;  %v5427_v23 = vpop.f32.mrb[42].mxu1  ;;  %v6156_v7 = vpack.c.bf16 %v4402_v6, %v4401_v5 }
 0xcaf   :  { %v3431_v24 = vpop.f32.mrb[43].mxu1  ;;  %6089 = vmatprep.subr.bf16.mxu1 %v6088_v20 }
 0xcb0   :  { %5463 = vmatprep.mubr.f32.mxu1 %v3431_v24  ;;  %v4066_v24 = vld [vmem:[#allocation13 + $0x40] sm:$0xff] }
 0xcb1   :  { %5464 = vmatmul.mubr.f32.gmra.mrb[46].mxu1 %v5427_v23  ;;  %v6200_v23 = vpack.c.bf16 %v4065_v22, %v4064_v21 }
 0xcb2   :  { %6091 = vmatpush3.bf16.msra.mxu1 %v6088_v20  ;;  %5498 = vmatprep.mubr.f32.mxu1 %v3303_v13  ;;  %v4059_v13 = vld [vmem:[#allocation13 + $0x8] sm:$0xff]  ;;  %v6196_v20 = vpack.c.bf16 %v4063_v19, %v4062_v18 }
 0xcb3   :  { %6093 = vmatprep.subr.bf16.mxu1 %v6092_v25 }
 0xcb6   :  { %6095 = vmatpush3.bf16.msra.mxu1 %v6092_v25  ;;  %v4067_v25 = vld [vmem:[#allocation13 + $0x48] sm:$0xff] }
 0xcb7   :  { %6097 = vmatprep.subr.bf16.mxu1 %v6096_v29  ;;  %v6204_v26 = vpack.c.bf16 %v4067_v25, %v4066_v24 }
 0xcba   :  { %6099 = vmatpush3.bf16.msra.mxu1 %v6096_v29  ;;  %v4069_v29 = vld [vmem:[#allocation13 + $0x58] sm:$0xff] }
 0xcbb   :  { %6101 = vmatprep.subr.bf16.mxu1 %v6100_v32  ;;  %v6208_v30 = vpack.c.bf16 %v4069_v29, %v4068_v28 }
 0xcbe   :  { %6103 = vmatpush3.bf16.msra.mxu1 %v6100_v32  ;;  %v4071_v32 = vld [vmem:[#allocation13 + $0x68] sm:$0xff] }
 0xcbf   :  { %6105 = vmatprep.subr.bf16.mxu1 %v6104_v34  ;;  %v6212_v33 = vpack.c.bf16 %v4071_v32, %v4070_v31 }
 0xcc2   :  { %6107 = vmatpush3.bf16.msra.mxu1 %v6104_v34  ;;  %v4404_v34 = vld [vmem:[%s7658_s18 + $0x198] sm:$0xff] }
 0xcc3   :  { %6109 = vmatprep.subr.bf16.mxu1 %v6108_v27 }
 0xcc6   :  { %6111 = vmatpush3.bf16.msra.mxu1 %v6108_v27  ;;  %v6160_v27 = vpack.c.bf16 %v4404_v34, %v4403_v47 }
 0xcc7   :  { %6113 = vmatprep.subr.bf16.mxu1 %v6112_v39 }
 0xcca   :  { %6115 = vmatpush3.bf16.msra.mxu1 %v6112_v39 }
 0xccb   :  { %6117 = vmatprep.subr.bf16.mxu1 %v7351_v37 }
 0xccd   :  { %5499 = vmatmul.mubr.f32.vlgmr.msra.gmra.mrb[44].mxu1 %v5414_v12  ;;  %v4058_v12 = vld [vmem:[#allocation13] sm:$0xff] }
 0xcce   :  { %5501 = vmatprep.mubr.f32.mxu1 %v3313_v15  ;;  %6119 = vmatpush3.bf16.msra.mxu1 %v7351_v37  ;;  %v4370_v37 = vld [vmem:[%s7657_s17 + $0x48] sm:$0xff]  ;;  %v6188_v15 = vpack.c.bf16 %v4059_v13, %v4058_v12 }
 0xccf   :  { %6121 = vmatprep.subr.bf16.mxu1 %v6120_v42 }
 0xcd0   :  { %6189 = vmatprep.subr.bf16.mxu0 %v6188_v15 }
 0xcd1   :  { %5502 = vmatmul.mubr.f32.gmra.mrb[46].mxu1 %v5417_v14  ;;  %v4060_v14 = vld [vmem:[#allocation13 + $0x10] sm:$0xff]  ;;  %6191 = vmatpush3.bf16.msra.mxu0 %v6188_v15 }
 0xcd2   :  { %5508 = vmatprep.mubr.msk.f32.mxu1 %vm1168_vm1, %v4369_v43  ;;  %v6192_v17 = vpack.c.bf16 %v4061_v16, %v4060_v14  ;;  %v4408_v43 = vld [vmem:[%s7658_s18 + $0x1b8] sm:$0xff] }
 0xcd4   :  { %6193 = vmatprep.subr.bf16.mxu0 %v6192_v17 }
 0xcd5   :  { %5509 = vmatmul.mubr.msk.f32.vlgmr.msra.gmra.mrb[48].mxu1 %vm1168_vm1, %v4370_v37  ;;  %6195 = vmatpush3.bf16.msra.mxu0 %v6192_v17  ;;  %v4410_v37 = vld [vmem:[%s7658_s18 + $0x1c8] sm:$0xff] }
 0xcd6   :  { %5511 = vmatprep.mubr.msk.f32.mxu1 %vm1168_vm1, %v4371_v48  ;;  %6123 = vmatpush3.bf16.msra.mxu1 %v6120_v42  ;;  %v4407_v42 = vld [vmem:[%s7658_s18 + $0x1b0] sm:$0xff]  ;;  %v6172_v48 = vpack.c.bf16 %v4410_v37, %v4409_v45 }
 0xcd7   :  { %6125 = vmatprep.subr.bf16.mxu1 %v6124_v49  ;;  %6197 = vmatprep.subr.bf16.mxu0 %v6196_v20  ;;  %v6168_v44 = vpack.c.bf16 %v4408_v43, %v4407_v42 }
 0xcd9   :  { %5512 = vmatmul.mubr.msk.f32.gmra.mrb[50].mxu1 %vm1168_vm1, %v4372_v52  ;;  %6199 = vmatpush3.bf16.msra.mxu0 %v6196_v20  ;;  %v4413_v52 = vld [vmem:[%s7658_s18 + $0x1e0] sm:$0xff] }
 0xcda   :  { %6127 = vmatpush3.bf16.msra.mxu1 %v6124_v49  ;;  %6201 = vmatprep.subr.bf16.mxu0 %v6200_v23  ;;  %v4411_v49 = vld [vmem:[%s7658_s18 + $0x1d0] sm:$0xff] }
 0xcdb   :  { %6129 = vmatprep.subr.bf16.mxu1 %v6128_v53  ;;  %v6176_v51 = vpack.c.bf16 %v4412_v50, %v4411_v49 }
 0xcdd   :  { %6203 = vmatpush3.bf16.msra.mxu0 %v6200_v23 }
 0xcde   :  { %6131 = vmatpush3.bf16.msra.mxu1 %v6128_v53  ;;  %6205 = vmatprep.subr.bf16.mxu0 %v6204_v26  ;;  %v4414_v53 = vld [vmem:[%s7658_s18 + $0x1e8] sm:$0xff] }
 0xcdf   :  { %6133 = vmatprep.subr.bf16.mxu1 %v6132_v56  ;;  %v6180_v54 = vpack.c.bf16 %v4414_v53, %v4413_v52 }
 0xce1   :  { %6207 = vmatpush3.bf16.msra.mxu0 %v6204_v26 }
 0xce2   :  { %6135 = vmatpush3.bf16.msra.mxu1 %v6132_v56  ;;  %6209 = vmatprep.subr.bf16.mxu0 %v6208_v30  ;;  %v4416_v56 = vld [vmem:[%s7658_s18 + $0x1f8] sm:$0xff] }
 0xce3   :  { %6137 = vmatprep.subr.bf16.mxu1 %v6136_v59  ;;  %v6184_v57 = vpack.c.bf16 %v4416_v56, %v4415_v55 }
 0xce5   :  { %6211 = vmatpush3.bf16.msra.mxu0 %v6208_v30 }
 0xce6   :  { %6139 = vmatpush3.bf16.msra.mxu1 %v6136_v59  ;;  %6213 = vmatprep.subr.bf16.mxu0 %v6212_v33  ;;  %v4073_v59 = vld [vmem:[#allocation13 + $0x78] sm:$0xff] }
 0xce7   :  { %6141 = vmatprep.subr.bf16.mxu1 %v6140_v62  ;;  %v6216_v60 = vpack.c.bf16 %v4073_v59, %v4072_v58 }
 0xce9   :  { %6215 = vmatpush3.bf16.msra.mxu0 %v6212_v33 }
 0xcea   :  { %6143 = vmatpush3.bf16.msra.mxu1 %v6140_v62  ;;  %6217 = vmatprep.subr.bf16.mxu0 %v6216_v60 }
 0xceb   :  { %6145 = vmatprep.subr.bf16.mxu1 %v6144_v1 }
 0xced   :  { %6219 = vmatpush3.bf16.msra.mxu0 %v6216_v60 }
 0xcee   :  { %6147 = vmatpush3.bf16.msra.mxu1 %v6144_v1 }
 0xcef   :  { %6149 = vmatprep.subr.bf16.mxu1 %v6148_v4 }
 0xcf2   :  { %6151 = vmatpush3.bf16.msra.mxu1 %v6148_v4 }
 0xcf3   :  { %6157 = vmatprep.subr.bf16.mxu1 %v6156_v7 }
 0xda8   :  { %v5510_v35 = vpop.f32.mrb[48].mxu1 }
 0xda9   :  { %v3710_v36 = vpop.f32.mrb[49].mxu1 }
 0xdaa   :  { %5546 = vmatprep.mubr.f32.mxu1 %v3710_v36 }
 0xdab   :  { %5547 = vmatmul.mubr.f32.vlgmr.msra.gmra.mrb[44].mxu1 %v5510_v35 }
 0xdac   :  { %6159 = vmatpush3.bf16.msra.mxu1 %v6156_v7  ;;  %v5513_v39 = vpop.f32.mrb[50].mxu1 }
 0xdad   :  { %6161 = vmatprep.subr.bf16.mxu1 %v6160_v27  ;;  %v3720_v41 = vpop.f32.mrb[51].mxu1 }
 0xdae   :  { %5549 = vmatprep.mubr.f32.mxu1 %v3720_v41 }
 0xdaf   :  { %5550 = vmatmul.mubr.f32.gmra.mrb[46].mxu1 %v5513_v39 }
 0xdb0   :  { %6163 = vmatpush3.bf16.msra.mxu1 %v6160_v27  ;;  %5594 = vmatprep.mubr.f32.mxu1 %v3918_v9 }
 0xdb1   :  { %6165 = vmatprep.subr.bf16.mxu1 %v6164_v40 }
 0xdb4   :  { %6167 = vmatpush3.bf16.msra.mxu1 %v6164_v40 }
 0xdb5   :  { %6169 = vmatprep.subr.bf16.mxu1 %v6168_v44 }
 0xdb8   :  { %6171 = vmatpush3.bf16.msra.mxu1 %v6168_v44 }
 0xdb9   :  { %6173 = vmatprep.subr.bf16.mxu1 %v6172_v48 }
 0xdbc   :  { %6175 = vmatpush3.bf16.msra.mxu1 %v6172_v48 }
 0xdbd   :  { %6177 = vmatprep.subr.bf16.mxu1 %v6176_v51 }
 0xdc0   :  { %6179 = vmatpush3.bf16.msra.mxu1 %v6176_v51 }
 0xdc1   :  { %6181 = vmatprep.subr.bf16.mxu1 %v6180_v54 }
 0xdc4   :  { %6183 = vmatpush3.bf16.msra.mxu1 %v6180_v54 }
 0xdc5   :  { %6185 = vmatprep.subr.bf16.mxu1 %v6184_v57 }
 0xdc8   :  { %6187 = vmatpush3.bf16.msra.mxu1 %v6184_v57 }
 0xdcb   :  { %5595 = vmatmul.mubr.f32.vlgmr.msra.gmra.mrb[44].mxu1 %v7571_v8 }
 0xdcc   :  { %5597 = vmatprep.mubr.f32.mxu1 %v7575_v11 }
 0xdcf   :  { %5598 = vmatmul.mubr.f32.gmra.mrb[46].mxu1 %v7573_v10  ;;  %v4418_v10 = vld [vmem:[%s7686_s2] ss:$0 sm:$0xff] }
 0xe9e   :  { %v5596_v62 = vpop.f32.mrb[44].mxu1 }
 0xe9f   :  { %v4051_v63 = vadd.f32 %v5596_v62, %v4417_v61  ;;  %v4020_v0 = vpop.f32.mrb[45].mxu1 }
 0xea0   :  { %v4050_v1 = vadd.f32 %v4417_v61, %v4020_v0 }
 0xea1   :  { %v4055_v4 = vmax.f32 %v4051_v63, 0.0 }
 0xea2   :  { %v4054_v2 = vmax.f32 %v4050_v1, 0.0  ;;  %v5599_v3 = vpop.f32.mrb[46].mxu1 }
 0xea3   :  { %v4053_v5 = vadd.f32 %v5599_v3, %v4417_v61  ;;  %v4030_v6 = vpop.f32.mrb[47].mxu1 }
 0xea4   :  { %v4052_v7 = vadd.f32 %v4417_v61, %v4030_v6  ;;  %5632 = vmatprep.mubr.f32.mxu0 %v4054_v2 }
 0xea5   :  { %5633 = vmatmul.mubr.f32.vlgmr.msra.gmra.mrb[30].mxu0 %v4055_v4  ;;  %v4057_v9 = vmax.f32 %v4053_v5, 0.0 }
 0xea6   :  { %v4056_v8 = vmax.f32 %v4052_v7, 0.0 }
 0xea8   :  { %5635 = vmatprep.mubr.f32.mxu0 %v4056_v8 }
 0xea9   :  { %5636 = vmatmul.mubr.f32.gmra.mrb[32].mxu0 %v4057_v9 }
 0xf78   :  { %v5634_v11 = vpop.f32.mrb[30].mxu0 }
 0xf79   :  { %v4153_v12 = vadd.f32 %v5634_v11, %v4418_v10  ;;  %v4147_v13 = vpop.f32.mrb[31].mxu0 }
 0xf7a   :  { %v4148_v14 = vadd.f32 %v4418_v10, %v4147_v13 }
 0xf7b   :  { %4167 = vst [vmem:[%s7687_s21 + $0x8] sm:$0xff] %v4153_v12 }
 0xf7c   :  { %4166 = vst [vmem:[%s7687_s21] sm:$0xff] %v4148_v14  ;;  %v5637_v15 = vpop.f32.mrb[32].mxu0 }
 0xf7d   :  { %v4163_v16 = vadd.f32 %v5637_v15, %v4418_v10  ;;  %v4157_v17 = vpop.f32.mrb[33].mxu0 }
 0xf7e   :  { %v4158_v18 = vadd.f32 %v4418_v10, %v4157_v17 }
 0xf7f   :  { %4169 = vst [vmem:[%s7687_s21 + $0x18] sm:$0xff] %v4163_v16 }
 0xf80   :  { %4168 = vst [vmem:[%s7687_s21 + $0x10] sm:$0xff] %v4158_v18 }
 0xf81   :  { %4174 = vsyncpa [#allocation3], 1 }
 0xf82   :  { %4175 = vsyncpa [#allocation5], 1 }
 0xf83   :  { %4176 = vsyncpa [#allocation8], 1 }
 0xf84   :  { %4177 = vsyncpa [#allocation11], 1 }
 0xf85   :  { %4178 = vsyncpa [#allocation14], 1 }

</bundles_post_ra>
